<compile_context>
chip_gen: v6e
topology: v6e:2x2x1
jax: 0.10.0
libtpu: 0.0.40
codegen_flags: <defaults>
</compile_context>

<pallas_src>
import jax
import jax.numpy as jnp
from jax import lax
from jax.experimental import pallas as pl
from jax.experimental.pallas import tpu as pltpu


# ------------------------------ Pallas kernel ------------------------------- #
def _make_dqn_kernel(h1, w1, h2, zw):
    """Fused whole-network kernel for one batch element.

    Ref shapes (per grid step):
      xs_ref : (1, (h1+1)*64, w1+1)  space-to-depth(4) input; row = bi*64 + c64,
               c64 = ci*16 + pi*4 + pj, xs[bi*64+c64, bj] = x[ci, 4bi+pi, 4bj+pj]
      w1_ref : (2, 16, 128)   conv1 taps: w1[dbj, co, dbi*64 + c64]
      b1_ref : (16, 1)
      w2_ref : (4, 32, 64)    conv2 taps: w2[kw, co, kh*16 + ci]
      b2_ref : (32, 1)
      l1_ref : (zw, 256)      Linear1 weight with conv2's stride-2 W decimation
                              folded in (odd rows are zero)
      l1b_ref: (1, 256)
      l2_ref : (256, 2)
      l2b_ref: (1, 2)
      o_ref  : (1, 32, 2*h2)  lane index = h2_row*2 + q_value
      a1_ref : (h1*16, w1)    VMEM scratch: conv1 activations, row = i*16 + c
    """

    def kernel(xs_ref, w1_ref, b1_ref, w2_ref, b2_ref,
               l1_ref, l1b_ref, l2_ref, l2b_ref, o_ref, a1_ref):
        # ---- conv1 (8x8, stride 4) == 2x2 stride-1 conv on the s2d input ----
        # One (16,128)@(128,w1) dot per (output row, dbj) tap: 2*h1 dots.
        for i in range(h1):
            acc = jnp.dot(w1_ref[0],
                          xs_ref[0, i * 64:(i + 2) * 64, 0:w1],
                          preferred_element_type=jnp.float32)
            acc += jnp.dot(w1_ref[1],
                           xs_ref[0, i * 64:(i + 2) * 64, 1:w1 + 1],
                           preferred_element_type=jnp.float32)
            a1_ref[i * 16:(i + 1) * 16, :] = jnp.maximum(acc + b1_ref[...], 0.0)

        # ---- conv2 (4x4, stride 2) + Linear(32,256) + ReLU + Linear(256,2) ---
        # conv2 is evaluated at stride 1 along W (contiguous slices); the
        # decimation to every other column is folded into l1_ref's zero rows.
        for i2 in range(h2):
            base = 2 * i2 * 16
            z = jnp.dot(w2_ref[0], a1_ref[base:base + 64, 0:zw],
                        preferred_element_type=jnp.float32)
            for kw in range(1, 4):
                z += jnp.dot(w2_ref[kw], a1_ref[base:base + 64, kw:kw + zw],
                             preferred_element_type=jnp.float32)
            z = jnp.maximum(z + b2_ref[...], 0.0)                 # (32, zw)
            hid = jnp.dot(z, l1_ref[...], preferred_element_type=jnp.float32)
            hid = jnp.maximum(hid + l1b_ref[...], 0.0)            # (32, 256)
            out = jnp.dot(hid, l2_ref[...], preferred_element_type=jnp.float32)
            o_ref[0, :, 2 * i2:2 * i2 + 2] = out + l2b_ref[...]   # (32, 2)

    return kernel


# ------------------------------ pallas_call wrapper ------------------------- #
def _dqn_pallas(xs, w1r, b1, w2r, b2, l1sel, l1b, l2t, l2b):
    n, rows, bw = xs.shape
    assert rows % 64 == 0
    bh = rows // 64
    h1, w1 = bh - 1, bw - 1
    h2 = (h1 - 4) // 2 + 1
    zw = w1 - 3
    assert l1sel.shape[0] == zw, (l1sel.shape, zw)

    kernel = _make_dqn_kernel(h1, w1, h2, zw)
    return pl.pallas_call(
        kernel,
        out_shape=jax.ShapeDtypeStruct((n, 32, 2 * h2), jnp.float32),
        grid=(n,),
        in_specs=[
            pl.BlockSpec((1, rows, bw), lambda i: (i, 0, 0)),
            pl.BlockSpec(w1r.shape, lambda i: (0, 0, 0)),
            pl.BlockSpec(b1.shape, lambda i: (0, 0)),
            pl.BlockSpec(w2r.shape, lambda i: (0, 0, 0)),
            pl.BlockSpec(b2.shape, lambda i: (0, 0)),
            pl.BlockSpec(l1sel.shape, lambda i: (0, 0)),
            pl.BlockSpec(l1b.shape, lambda i: (0, 0)),
            pl.BlockSpec(l2t.shape, lambda i: (0, 0)),
            pl.BlockSpec(l2b.shape, lambda i: (0, 0)),
        ],
        out_specs=pl.BlockSpec((1, 32, 2 * h2), lambda i: (i, 0, 0)),
        scratch_shapes=[pltpu.VMEM((h1 * 16, w1), jnp.float32)],
        compiler_params=pltpu.CompilerParams(
            dimension_semantics=("parallel",)),
    )(xs, w1r, b1, w2r, b2, l1sel, l1b, l2t, l2b)


# --------------------------- one-time weight repack -------------------------- #
def prepare_params(params, input_hw=(28, 268)):
    """Repack PyTorch-layout weights for the fused kernel (done once, outside
    the per-step jitted forward, per perf review)."""
    h, w = input_hw
    assert h % 4 == 0 and w % 4 == 0, (h, w)
    h1, w1 = (h - 8) // 4 + 1, (w - 8) // 4 + 1
    w2 = (w1 - 4) // 2 + 1
    l1_out, l1_in = params["l1_w"].shape                 # (256, 32)
    # Linear(32,256) acts on the raw NCHW width axis, so conv2's W2 must be 32.
    assert w2 == l1_in, (w2, l1_in)
    zw = w1 - 3

    f32 = jnp.float32
    # conv1: (co, ci, kh=4*dbi+pi, kw=4*dbj+pj) -> w1r[dbj, co, dbi*64+ci*16+pi*4+pj]
    w1r = params["c1_w"].astype(f32).reshape(16, 4, 2, 4, 2, 4)
    w1r = jnp.transpose(w1r, (4, 0, 2, 1, 3, 5)).reshape(2, 16, 128)
    # conv2: (co, ci, kh, kw) -> w2r[kw, co, kh*16 + ci]
    w2r = jnp.transpose(params["c2_w"].astype(f32), (3, 0, 2, 1)).reshape(4, 32, 64)
    # Linear1 with conv2's stride-2 W decimation folded in: row 2j holds l1_w[:, j].
    l1sel = jnp.zeros((zw, l1_out), f32).at[0::2, :].set(
        params["l1_w"].astype(f32).T)
    return {
        "w1r": w1r,
        "b1": params["c1_b"].astype(f32).reshape(16, 1),
        "w2r": w2r,
        "b2": params["c2_b"].astype(f32).reshape(32, 1),
        "l1sel": l1sel,
        "l1b": params["l1_b"].astype(f32).reshape(1, l1_out),
        "l2t": params["l2_w"].astype(f32).T,             # (256, 2)
        "l2b": params["l2_b"].astype(f32).reshape(1, -1),
    }


# --------------------------------- forward ---------------------------------- #
@jax.jit
def dqn_forward(prepped, x):
    n, c, h, w = x.shape
    assert c == 4 and h % 4 == 0 and w % 4 == 0, (c, h, w)
    # TODO(synk): the space-to-depth(4) transpose stays in XLA (pure data
    # movement, same byte count as x); an in-kernel equivalent needs a stride-4
    # lane gather, which has no clean Pallas expression.
    xs = x.reshape(n, c, h // 4, 4, w // 4, 4)
    xs = jnp.transpose(xs, (0, 2, 1, 3, 5, 4))           # n, bi, ci, pi, pj, bj
    xs = xs.reshape(n, (h // 4) * 64, w // 4)
    out = _dqn_pallas(xs, prepped["w1r"], prepped["b1"], prepped["w2r"],
                      prepped["b2"], prepped["l1sel"], prepped["l1b"],
                      prepped["l2t"], prepped["l2b"])    # (N, 32, 2*H2)
    h2 = out.shape[-1] // 2
    return out.reshape(n, 32, h2, 2)                     # NCHW, free reshape


# --------------------------- deterministic params --------------------------- #
def init_params(key):
    ks = jax.random.split(key, 8)

    def u(k, shape, fan_in):
        bound = 1.0 / jnp.sqrt(jnp.float32(fan_in))
        return jax.random.uniform(k, shape, jnp.float32, -bound, bound)

    return {
        "c1_w": u(ks[0], (16, 4, 8, 8), 4 * 8 * 8),
        "c1_b": u(ks[1], (16,), 4 * 8 * 8),
        "c2_w": u(ks[2], (32, 16, 4, 4), 16 * 4 * 4),
        "c2_b": u(ks[3], (32,), 16 * 4 * 4),
        "l1_w": u(ks[4], (256, 32), 32),
        "l1_b": u(ks[5], (256,), 32),
        "l2_w": u(ks[6], (2, 256), 256),
        "l2_b": u(ks[7], (2,), 256),
    }


# -------------------------------- reference --------------------------------- #
def dqn_reference(params, x):
    def conv(x, w, b, s):
        y = lax.conv_general_dilated(
            x, w, (s, s), "VALID", dimension_numbers=("NCHW", "OIHW", "NCHW"))
        return jax.nn.relu(y + b[None, :, None, None])

    x = conv(x, params["c1_w"], params["c1_b"], 4)
    x = conv(x, params["c2_w"], params["c2_b"], 2)
    x = jax.nn.relu(jnp.einsum("nchw,ow->ncho", x, params["l1_w"]) + params["l1_b"])
    x = jnp.einsum("nchd,od->ncho", x, params["l2_w"]) + params["l2_b"]
    return x


if __name__ == "__main__":
    key = jax.random.PRNGKey(0)
    pkey, xkey = jax.random.split(key)
    params = init_params(pkey)

    # W=268 so the last axis after conv2 is 32 (required by Linear(32,256)
    # being applied to the raw NCHW tensor, exactly as in the PyTorch module).
    N, C, H, W = 2, 4, 28, 268
    x = jax.random.normal(xkey, (N, C, H, W), jnp.float32)

    prepped = prepare_params(params, input_hw=(H, W))
    out = jax.block_until_ready(dqn_forward(prepped, x))
    ref = jax.block_until_ready(dqn_reference(params, x))

    assert out.shape == (N, 32, 2, 2), out.shape
    assert jnp.allclose(out, ref, atol=1e-4, rtol=1e-4), float(
        jnp.max(jnp.abs(out - ref)))

    print("KERNEL_OK")
</pallas_src>

<mosaic_0001>
module attributes {stable_mosaic.version = 11 : i64} {
  func.func @kernel(%arg0: i32, %arg1: memref<1x448x67xf32, #tpu.memory_space<vmem>>, %arg2: memref<2x16x128xf32, #tpu.memory_space<vmem>>, %arg3: memref<16x1xf32, #tpu.memory_space<vmem>>, %arg4: memref<4x32x64xf32, #tpu.memory_space<vmem>>, %arg5: memref<32x1xf32, #tpu.memory_space<vmem>>, %arg6: memref<63x256xf32, #tpu.memory_space<vmem>>, %arg7: memref<1x256xf32, #tpu.memory_space<vmem>>, %arg8: memref<256x2xf32, #tpu.memory_space<vmem>>, %arg9: memref<1x2xf32, #tpu.memory_space<vmem>>, %arg10: memref<1x32x4xf32, #tpu.memory_space<vmem>>, %arg11: memref<96x66xf32, #tpu.memory_space<vmem>>) attributes {dimension_semantics = [#tpu.dimension_semantics<parallel>], iteration_bounds = array<i64: 2>, scalar_prefetch = 0 : i64, scratch_operands = 1 : i64, tpu.core_type = #tpu.core_type<tc>, window_params = [{transform_indices = @transform_0, window_bounds = array<i64: 1, 448, 67>}, {pipeline_mode = #tpu.pipeline_mode<synchronous>, transform_indices = @transform_1, window_bounds = array<i64: 2, 16, 128>}, {pipeline_mode = #tpu.pipeline_mode<synchronous>, transform_indices = @transform_2, window_bounds = array<i64: 16, 1>}, {pipeline_mode = #tpu.pipeline_mode<synchronous>, transform_indices = @transform_3, window_bounds = array<i64: 4, 32, 64>}, {pipeline_mode = #tpu.pipeline_mode<synchronous>, transform_indices = @transform_4, window_bounds = array<i64: 32, 1>}, {pipeline_mode = #tpu.pipeline_mode<synchronous>, transform_indices = @transform_5, window_bounds = array<i64: 63, 256>}, {pipeline_mode = #tpu.pipeline_mode<synchronous>, transform_indices = @transform_6, window_bounds = array<i64: 1, 256>}, {pipeline_mode = #tpu.pipeline_mode<synchronous>, transform_indices = @transform_7, window_bounds = array<i64: 256, 2>}, {pipeline_mode = #tpu.pipeline_mode<synchronous>, transform_indices = @transform_8, window_bounds = array<i64: 1, 2>}, {transform_indices = @transform_9, window_bounds = array<i64: 1, 32, 4>}]} {
    %c0 = arith.constant 0 : index
    %c0_0 = arith.constant 0 : index
    %c0_1 = arith.constant 0 : index
    %0 = vector.load %arg2[%c0, %c0_0, %c0_1] : memref<2x16x128xf32, #tpu.memory_space<vmem>>, vector<1x16x128xf32>
    %1 = vector.shape_cast %0 : vector<1x16x128xf32> to vector<16x128xf32>
    %c0_2 = arith.constant 0 : index
    %c0_3 = arith.constant 0 : index
    %c0_4 = arith.constant 0 : index
    %2 = vector.load %arg1[%c0_2, %c0_3, %c0_4] : memref<1x448x67xf32, #tpu.memory_space<vmem>>, vector<1x128x66xf32>
    %3 = vector.shape_cast %2 : vector<1x128x66xf32> to vector<128x66xf32>
    %cst = arith.constant dense<0.000000e+00> : vector<16x66xf32>
    %4 = tpu.matmul %1, %3, %cst {dimension_numbers = #tpu.dot_dimension_numbers<[1], [0], [0], [1], [0, 0, 1, 1], [], []>} : vector<16x128xf32>, vector<128x66xf32>, vector<16x66xf32> -> vector<16x66xf32>
    %c1 = arith.constant 1 : index
    %c0_5 = arith.constant 0 : index
    %c0_6 = arith.constant 0 : index
    %5 = vector.load %arg2[%c1, %c0_5, %c0_6] : memref<2x16x128xf32, #tpu.memory_space<vmem>>, vector<1x16x128xf32>
    %6 = vector.shape_cast %5 : vector<1x16x128xf32> to vector<16x128xf32>
    %c0_7 = arith.constant 0 : index
    %c0_8 = arith.constant 0 : index
    %c1_9 = arith.constant 1 : index
    %7 = vector.load %arg1[%c0_7, %c0_8, %c1_9] : memref<1x448x67xf32, #tpu.memory_space<vmem>>, vector<1x128x66xf32>
    %8 = vector.shape_cast %7 : vector<1x128x66xf32> to vector<128x66xf32>
    %cst_10 = arith.constant dense<0.000000e+00> : vector<16x66xf32>
    %9 = tpu.matmul %6, %8, %cst_10 {dimension_numbers = #tpu.dot_dimension_numbers<[1], [0], [0], [1], [0, 0, 1, 1], [], []>} : vector<16x128xf32>, vector<128x66xf32>, vector<16x66xf32> -> vector<16x66xf32>
    %10 = arith.addf %4, %9 : vector<16x66xf32>
    %c0_11 = arith.constant 0 : index
    %c0_12 = arith.constant 0 : index
    %11 = vector.load %arg3[%c0_11, %c0_12] : memref<16x1xf32, #tpu.memory_space<vmem>>, vector<16x1xf32>
    %12 = vector.broadcast %11 : vector<16x1xf32> to vector<16x66xf32>
    %13 = arith.addf %10, %12 : vector<16x66xf32>
    %cst_13 = arith.constant 0.000000e+00 : f32
    %14 = vector.broadcast %cst_13 : f32 to vector<16x66xf32>
    %15 = arith.maximumf %13, %14 : vector<16x66xf32>
    %c0_14 = arith.constant 0 : index
    %c0_15 = arith.constant 0 : index
    %16 = vector.load %arg11[%c0_14, %c0_15] : memref<96x66xf32, #tpu.memory_space<vmem>>, vector<16x66xf32>
    tpu.vector_store %arg11[%c0_14, %c0_15], %15 {strides = array<i32>} : memref<96x66xf32, #tpu.memory_space<vmem>>, vector<16x66xf32>,
    %c0_16 = arith.constant 0 : index
    %c0_17 = arith.constant 0 : index
    %c0_18 = arith.constant 0 : index
    %17 = vector.load %arg2[%c0_16, %c0_17, %c0_18] : memref<2x16x128xf32, #tpu.memory_space<vmem>>, vector<1x16x128xf32>
    %18 = vector.shape_cast %17 : vector<1x16x128xf32> to vector<16x128xf32>
    %c0_19 = arith.constant 0 : index
    %c64 = arith.constant 64 : index
    %c0_20 = arith.constant 0 : index
    %19 = vector.load %arg1[%c0_19, %c64, %c0_20] : memref<1x448x67xf32, #tpu.memory_space<vmem>>, vector<1x128x66xf32>
    %20 = vector.shape_cast %19 : vector<1x128x66xf32> to vector<128x66xf32>
    %cst_21 = arith.constant dense<0.000000e+00> : vector<16x66xf32>
    %21 = tpu.matmul %18, %20, %cst_21 {dimension_numbers = #tpu.dot_dimension_numbers<[1], [0], [0], [1], [0, 0, 1, 1], [], []>} : vector<16x128xf32>, vector<128x66xf32>, vector<16x66xf32> -> vector<16x66xf32>
    %c1_22 = arith.constant 1 : index
    %c0_23 = arith.constant 0 : index
    %c0_24 = arith.constant 0 : index
    %22 = vector.load %arg2[%c1_22, %c0_23, %c0_24] : memref<2x16x128xf32, #tpu.memory_space<vmem>>, vector<1x16x128xf32>
    %23 = vector.shape_cast %22 : vector<1x16x128xf32> to vector<16x128xf32>
    %c0_25 = arith.constant 0 : index
    %c64_26 = arith.constant 64 : index
    %c1_27 = arith.constant 1 : index
    %24 = vector.load %arg1[%c0_25, %c64_26, %c1_27] : memref<1x448x67xf32, #tpu.memory_space<vmem>>, vector<1x128x66xf32>
    %25 = vector.shape_cast %24 : vector<1x128x66xf32> to vector<128x66xf32>
    %cst_28 = arith.constant dense<0.000000e+00> : vector<16x66xf32>
    %26 = tpu.matmul %23, %25, %cst_28 {dimension_numbers = #tpu.dot_dimension_numbers<[1], [0], [0], [1], [0, 0, 1, 1], [], []>} : vector<16x128xf32>, vector<128x66xf32>, vector<16x66xf32> -> vector<16x66xf32>
    %27 = arith.addf %21, %26 : vector<16x66xf32>
    %c0_29 = arith.constant 0 : index
    %c0_30 = arith.constant 0 : index
    %28 = vector.load %arg3[%c0_29, %c0_30] : memref<16x1xf32, #tpu.memory_space<vmem>>, vector<16x1xf32>
    %29 = vector.broadcast %28 : vector<16x1xf32> to vector<16x66xf32>
    %30 = arith.addf %27, %29 : vector<16x66xf32>
    %cst_31 = arith.constant 0.000000e+00 : f32
    %31 = vector.broadcast %cst_31 : f32 to vector<16x66xf32>
    %32 = arith.maximumf %30, %31 : vector<16x66xf32>
    %c16 = arith.constant 16 : index
    %c0_32 = arith.constant 0 : index
    %33 = vector.load %arg11[%c16, %c0_32] : memref<96x66xf32, #tpu.memory_space<vmem>>, vector<16x66xf32>
    tpu.vector_store %arg11[%c16, %c0_32], %32 {strides = array<i32>} : memref<96x66xf32, #tpu.memory_space<vmem>>, vector<16x66xf32>,
    %c0_33 = arith.constant 0 : index
    %c0_34 = arith.constant 0 : index
    %c0_35 = arith.constant 0 : index
    %34 = vector.load %arg2[%c0_33, %c0_34, %c0_35] : memref<2x16x128xf32, #tpu.memory_space<vmem>>, vector<1x16x128xf32>
    %35 = vector.shape_cast %34 : vector<1x16x128xf32> to vector<16x128xf32>
    %c0_36 = arith.constant 0 : index
    %c128 = arith.constant 128 : index
    %c0_37 = arith.constant 0 : index
    %36 = vector.load %arg1[%c0_36, %c128, %c0_37] : memref<1x448x67xf32, #tpu.memory_space<vmem>>, vector<1x128x66xf32>
    %37 = vector.shape_cast %36 : vector<1x128x66xf32> to vector<128x66xf32>
    %cst_38 = arith.constant dense<0.000000e+00> : vector<16x66xf32>
    %38 = tpu.matmul %35, %37, %cst_38 {dimension_numbers = #tpu.dot_dimension_numbers<[1], [0], [0], [1], [0, 0, 1, 1], [], []>} : vector<16x128xf32>, vector<128x66xf32>, vector<16x66xf32> -> vector<16x66xf32>
    %c1_39 = arith.constant 1 : index
    %c0_40 = arith.constant 0 : index
    %c0_41 = arith.constant 0 : index
    %39 = vector.load %arg2[%c1_39, %c0_40, %c0_41] : memref<2x16x128xf32, #tpu.memory_space<vmem>>, vector<1x16x128xf32>
    %40 = vector.shape_cast %39 : vector<1x16x128xf32> to vector<16x128xf32>
    %c0_42 = arith.constant 0 : index
    %c128_43 = arith.constant 128 : index
    %c1_44 = arith.constant 1 : index
    %41 = vector.load %arg1[%c0_42, %c128_43, %c1_44] : memref<1x448x67xf32, #tpu.memory_space<vmem>>, vector<1x128x66xf32>
    %42 = vector.shape_cast %41 : vector<1x128x66xf32> to vector<128x66xf32>
    %cst_45 = arith.constant dense<0.000000e+00> : vector<16x66xf32>
    %43 = tpu.matmul %40, %42, %cst_45 {dimension_numbers = #tpu.dot_dimension_numbers<[1], [0], [0], [1], [0, 0, 1, 1], [], []>} : vector<16x128xf32>, vector<128x66xf32>, vector<16x66xf32> -> vector<16x66xf32>
    %44 = arith.addf %38, %43 : vector<16x66xf32>
    %c0_46 = arith.constant 0 : index
    %c0_47 = arith.constant 0 : index
    %45 = vector.load %arg3[%c0_46, %c0_47] : memref<16x1xf32, #tpu.memory_space<vmem>>, vector<16x1xf32>
    %46 = vector.broadcast %45 : vector<16x1xf32> to vector<16x66xf32>
    %47 = arith.addf %44, %46 : vector<16x66xf32>
    %cst_48 = arith.constant 0.000000e+00 : f32
    %48 = vector.broadcast %cst_48 : f32 to vector<16x66xf32>
    %49 = arith.maximumf %47, %48 : vector<16x66xf32>
    %c32 = arith.constant 32 : index
    %c0_49 = arith.constant 0 : index
    %50 = vector.load %arg11[%c32, %c0_49] : memref<96x66xf32, #tpu.memory_space<vmem>>, vector<16x66xf32>
    tpu.vector_store %arg11[%c32, %c0_49], %49 {strides = array<i32>} : memref<96x66xf32, #tpu.memory_space<vmem>>, vector<16x66xf32>,
    %c0_50 = arith.constant 0 : index
    %c0_51 = arith.constant 0 : index
    %c0_52 = arith.constant 0 : index
    %51 = vector.load %arg2[%c0_50, %c0_51, %c0_52] : memref<2x16x128xf32, #tpu.memory_space<vmem>>, vector<1x16x128xf32>
    %52 = vector.shape_cast %51 : vector<1x16x128xf32> to vector<16x128xf32>
    %c0_53 = arith.constant 0 : index
    %c192 = arith.constant 192 : index
    %c0_54 = arith.constant 0 : index
    %53 = vector.load %arg1[%c0_53, %c192, %c0_54] : memref<1x448x67xf32, #tpu.memory_space<vmem>>, vector<1x128x66xf32>
    %54 = vector.shape_cast %53 : vector<1x128x66xf32> to vector<128x66xf32>
    %cst_55 = arith.constant dense<0.000000e+00> : vector<16x66xf32>
    %55 = tpu.matmul %52, %54, %cst_55 {dimension_numbers = #tpu.dot_dimension_numbers<[1], [0], [0], [1], [0, 0, 1, 1], [], []>} : vector<16x128xf32>, vector<128x66xf32>, vector<16x66xf32> -> vector<16x66xf32>
    %c1_56 = arith.constant 1 : index
    %c0_57 = arith.constant 0 : index
    %c0_58 = arith.constant 0 : index
    %56 = vector.load %arg2[%c1_56, %c0_57, %c0_58] : memref<2x16x128xf32, #tpu.memory_space<vmem>>, vector<1x16x128xf32>
    %57 = vector.shape_cast %56 : vector<1x16x128xf32> to vector<16x128xf32>
    %c0_59 = arith.constant 0 : index
    %c192_60 = arith.constant 192 : index
    %c1_61 = arith.constant 1 : index
    %58 = vector.load %arg1[%c0_59, %c192_60, %c1_61] : memref<1x448x67xf32, #tpu.memory_space<vmem>>, vector<1x128x66xf32>
    %59 = vector.shape_cast %58 : vector<1x128x66xf32> to vector<128x66xf32>
    %cst_62 = arith.constant dense<0.000000e+00> : vector<16x66xf32>
    %60 = tpu.matmul %57, %59, %cst_62 {dimension_numbers = #tpu.dot_dimension_numbers<[1], [0], [0], [1], [0, 0, 1, 1], [], []>} : vector<16x128xf32>, vector<128x66xf32>, vector<16x66xf32> -> vector<16x66xf32>
    %61 = arith.addf %55, %60 : vector<16x66xf32>
    %c0_63 = arith.constant 0 : index
    %c0_64 = arith.constant 0 : index
    %62 = vector.load %arg3[%c0_63, %c0_64] : memref<16x1xf32, #tpu.memory_space<vmem>>, vector<16x1xf32>
    %63 = vector.broadcast %62 : vector<16x1xf32> to vector<16x66xf32>
    %64 = arith.addf %61, %63 : vector<16x66xf32>
    %cst_65 = arith.constant 0.000000e+00 : f32
    %65 = vector.broadcast %cst_65 : f32 to vector<16x66xf32>
    %66 = arith.maximumf %64, %65 : vector<16x66xf32>
    %c48 = arith.constant 48 : index
    %c0_66 = arith.constant 0 : index
    %67 = vector.load %arg11[%c48, %c0_66] : memref<96x66xf32, #tpu.memory_space<vmem>>, vector<16x66xf32>
    tpu.vector_store %arg11[%c48, %c0_66], %66 {strides = array<i32>} : memref<96x66xf32, #tpu.memory_space<vmem>>, vector<16x66xf32>,
    %c0_67 = arith.constant 0 : index
    %c0_68 = arith.constant 0 : index
    %c0_69 = arith.constant 0 : index
    %68 = vector.load %arg2[%c0_67, %c0_68, %c0_69] : memref<2x16x128xf32, #tpu.memory_space<vmem>>, vector<1x16x128xf32>
    %69 = vector.shape_cast %68 : vector<1x16x128xf32> to vector<16x128xf32>
    %c0_70 = arith.constant 0 : index
    %c256 = arith.constant 256 : index
    %c0_71 = arith.constant 0 : index
    %70 = vector.load %arg1[%c0_70, %c256, %c0_71] : memref<1x448x67xf32, #tpu.memory_space<vmem>>, vector<1x128x66xf32>
    %71 = vector.shape_cast %70 : vector<1x128x66xf32> to vector<128x66xf32>
    %cst_72 = arith.constant dense<0.000000e+00> : vector<16x66xf32>
    %72 = tpu.matmul %69, %71, %cst_72 {dimension_numbers = #tpu.dot_dimension_numbers<[1], [0], [0], [1], [0, 0, 1, 1], [], []>} : vector<16x128xf32>, vector<128x66xf32>, vector<16x66xf32> -> vector<16x66xf32>
    %c1_73 = arith.constant 1 : index
    %c0_74 = arith.constant 0 : index
    %c0_75 = arith.constant 0 : index
    %73 = vector.load %arg2[%c1_73, %c0_74, %c0_75] : memref<2x16x128xf32, #tpu.memory_space<vmem>>, vector<1x16x128xf32>
    %74 = vector.shape_cast %73 : vector<1x16x128xf32> to vector<16x128xf32>
    %c0_76 = arith.constant 0 : index
    %c256_77 = arith.constant 256 : index
    %c1_78 = arith.constant 1 : index
    %75 = vector.load %arg1[%c0_76, %c256_77, %c1_78] : memref<1x448x67xf32, #tpu.memory_space<vmem>>, vector<1x128x66xf32>
    %76 = vector.shape_cast %75 : vector<1x128x66xf32> to vector<128x66xf32>
    %cst_79 = arith.constant dense<0.000000e+00> : vector<16x66xf32>
    %77 = tpu.matmul %74, %76, %cst_79 {dimension_numbers = #tpu.dot_dimension_numbers<[1], [0], [0], [1], [0, 0, 1, 1], [], []>} : vector<16x128xf32>, vector<128x66xf32>, vector<16x66xf32> -> vector<16x66xf32>
    %78 = arith.addf %72, %77 : vector<16x66xf32>
    %c0_80 = arith.constant 0 : index
    %c0_81 = arith.constant 0 : index
    %79 = vector.load %arg3[%c0_80, %c0_81] : memref<16x1xf32, #tpu.memory_space<vmem>>, vector<16x1xf32>
    %80 = vector.broadcast %79 : vector<16x1xf32> to vector<16x66xf32>
    %81 = arith.addf %78, %80 : vector<16x66xf32>
    %cst_82 = arith.constant 0.000000e+00 : f32
    %82 = vector.broadcast %cst_82 : f32 to vector<16x66xf32>
    %83 = arith.maximumf %81, %82 : vector<16x66xf32>
    %c64_83 = arith.constant 64 : index
    %c0_84 = arith.constant 0 : index
    %84 = vector.load %arg11[%c64_83, %c0_84] : memref<96x66xf32, #tpu.memory_space<vmem>>, vector<16x66xf32>
    tpu.vector_store %arg11[%c64_83, %c0_84], %83 {strides = array<i32>} : memref<96x66xf32, #tpu.memory_space<vmem>>, vector<16x66xf32>,
    %c0_85 = arith.constant 0 : index
    %c0_86 = arith.constant 0 : index
    %c0_87 = arith.constant 0 : index
    %85 = vector.load %arg2[%c0_85, %c0_86, %c0_87] : memref<2x16x128xf32, #tpu.memory_space<vmem>>, vector<1x16x128xf32>
    %86 = vector.shape_cast %85 : vector<1x16x128xf32> to vector<16x128xf32>
    %c0_88 = arith.constant 0 : index
    %c320 = arith.constant 320 : index
    %c0_89 = arith.constant 0 : index
    %87 = vector.load %arg1[%c0_88, %c320, %c0_89] : memref<1x448x67xf32, #tpu.memory_space<vmem>>, vector<1x128x66xf32>
    %88 = vector.shape_cast %87 : vector<1x128x66xf32> to vector<128x66xf32>
    %cst_90 = arith.constant dense<0.000000e+00> : vector<16x66xf32>
    %89 = tpu.matmul %86, %88, %cst_90 {dimension_numbers = #tpu.dot_dimension_numbers<[1], [0], [0], [1], [0, 0, 1, 1], [], []>} : vector<16x128xf32>, vector<128x66xf32>, vector<16x66xf32> -> vector<16x66xf32>
    %c1_91 = arith.constant 1 : index
    %c0_92 = arith.constant 0 : index
    %c0_93 = arith.constant 0 : index
    %90 = vector.load %arg2[%c1_91, %c0_92, %c0_93] : memref<2x16x128xf32, #tpu.memory_space<vmem>>, vector<1x16x128xf32>
    %91 = vector.shape_cast %90 : vector<1x16x128xf32> to vector<16x128xf32>
    %c0_94 = arith.constant 0 : index
    %c320_95 = arith.constant 320 : index
    %c1_96 = arith.constant 1 : index
    %92 = vector.load %arg1[%c0_94, %c320_95, %c1_96] : memref<1x448x67xf32, #tpu.memory_space<vmem>>, vector<1x128x66xf32>
    %93 = vector.shape_cast %92 : vector<1x128x66xf32> to vector<128x66xf32>
    %cst_97 = arith.constant dense<0.000000e+00> : vector<16x66xf32>
    %94 = tpu.matmul %91, %93, %cst_97 {dimension_numbers = #tpu.dot_dimension_numbers<[1], [0], [0], [1], [0, 0, 1, 1], [], []>} : vector<16x128xf32>, vector<128x66xf32>, vector<16x66xf32> -> vector<16x66xf32>
    %95 = arith.addf %89, %94 : vector<16x66xf32>
    %c0_98 = arith.constant 0 : index
    %c0_99 = arith.constant 0 : index
    %96 = vector.load %arg3[%c0_98, %c0_99] : memref<16x1xf32, #tpu.memory_space<vmem>>, vector<16x1xf32>
    %97 = vector.broadcast %96 : vector<16x1xf32> to vector<16x66xf32>
    %98 = arith.addf %95, %97 : vector<16x66xf32>
    %cst_100 = arith.constant 0.000000e+00 : f32
    %99 = vector.broadcast %cst_100 : f32 to vector<16x66xf32>
    %100 = arith.maximumf %98, %99 : vector<16x66xf32>
    %c80 = arith.constant 80 : index
    %c0_101 = arith.constant 0 : index
    %101 = vector.load %arg11[%c80, %c0_101] : memref<96x66xf32, #tpu.memory_space<vmem>>, vector<16x66xf32>
    tpu.vector_store %arg11[%c80, %c0_101], %100 {strides = array<i32>} : memref<96x66xf32, #tpu.memory_space<vmem>>, vector<16x66xf32>,
    %c0_102 = arith.constant 0 : index
    %c0_103 = arith.constant 0 : index
    %c0_104 = arith.constant 0 : index
    %102 = vector.load %arg4[%c0_102, %c0_103, %c0_104] : memref<4x32x64xf32, #tpu.memory_space<vmem>>, vector<1x32x64xf32>
    %103 = vector.shape_cast %102 : vector<1x32x64xf32> to vector<32x64xf32>
    %c0_105 = arith.constant 0 : index
    %c0_106 = arith.constant 0 : index
    %104 = vector.load %arg11[%c0_105, %c0_106] : memref<96x66xf32, #tpu.memory_space<vmem>>, vector<64x63xf32>
    %cst_107 = arith.constant dense<0.000000e+00> : vector<32x63xf32>
    %105 = tpu.matmul %103, %104, %cst_107 {dimension_numbers = #tpu.dot_dimension_numbers<[1], [0], [0], [1], [0, 0, 1, 1], [], []>} : vector<32x64xf32>, vector<64x63xf32>, vector<32x63xf32> -> vector<32x63xf32>
    %c1_108 = arith.constant 1 : index
    %c0_109 = arith.constant 0 : index
    %c0_110 = arith.constant 0 : index
    %106 = vector.load %arg4[%c1_108, %c0_109, %c0_110] : memref<4x32x64xf32, #tpu.memory_space<vmem>>, vector<1x32x64xf32>
    %107 = vector.shape_cast %106 : vector<1x32x64xf32> to vector<32x64xf32>
    %c0_111 = arith.constant 0 : index
    %c1_112 = arith.constant 1 : index
    %108 = vector.load %arg11[%c0_111, %c1_112] : memref<96x66xf32, #tpu.memory_space<vmem>>, vector<64x63xf32>
    %cst_113 = arith.constant dense<0.000000e+00> : vector<32x63xf32>
    %109 = tpu.matmul %107, %108, %cst_113 {dimension_numbers = #tpu.dot_dimension_numbers<[1], [0], [0], [1], [0, 0, 1, 1], [], []>} : vector<32x64xf32>, vector<64x63xf32>, vector<32x63xf32> -> vector<32x63xf32>
    %110 = arith.addf %105, %109 : vector<32x63xf32>
    %c2 = arith.constant 2 : index
    %c0_114 = arith.constant 0 : index
    %c0_115 = arith.constant 0 : index
    %111 = vector.load %arg4[%c2, %c0_114, %c0_115] : memref<4x32x64xf32, #tpu.memory_space<vmem>>, vector<1x32x64xf32>
    %112 = vector.shape_cast %111 : vector<1x32x64xf32> to vector<32x64xf32>
    %c0_116 = arith.constant 0 : index
    %c2_117 = arith.constant 2 : index
    %113 = vector.load %arg11[%c0_116, %c2_117] : memref<96x66xf32, #tpu.memory_space<vmem>>, vector<64x63xf32>
    %cst_118 = arith.constant dense<0.000000e+00> : vector<32x63xf32>
    %114 = tpu.matmul %112, %113, %cst_118 {dimension_numbers = #tpu.dot_dimension_numbers<[1], [0], [0], [1], [0, 0, 1, 1], [], []>} : vector<32x64xf32>, vector<64x63xf32>, vector<32x63xf32> -> vector<32x63xf32>
    %115 = arith.addf %110, %114 : vector<32x63xf32>
    %c3 = arith.constant 3 : index
    %c0_119 = arith.constant 0 : index
    %c0_120 = arith.constant 0 : index
    %116 = vector.load %arg4[%c3, %c0_119, %c0_120] : memref<4x32x64xf32, #tpu.memory_space<vmem>>, vector<1x32x64xf32>
    %117 = vector.shape_cast %116 : vector<1x32x64xf32> to vector<32x64xf32>
    %c0_121 = arith.constant 0 : index
    %c3_122 = arith.constant 3 : index
    %118 = vector.load %arg11[%c0_121, %c3_122] : memref<96x66xf32, #tpu.memory_space<vmem>>, vector<64x63xf32>
    %cst_123 = arith.constant dense<0.000000e+00> : vector<32x63xf32>
    %119 = tpu.matmul %117, %118, %cst_123 {dimension_numbers = #tpu.dot_dimension_numbers<[1], [0], [0], [1], [0, 0, 1, 1], [], []>} : vector<32x64xf32>, vector<64x63xf32>, vector<32x63xf32> -> vector<32x63xf32>
    %120 = arith.addf %115, %119 : vector<32x63xf32>
    %c0_124 = arith.constant 0 : index
    %c0_125 = arith.constant 0 : index
    %121 = vector.load %arg5[%c0_124, %c0_125] : memref<32x1xf32, #tpu.memory_space<vmem>>, vector<32x1xf32>
    %122 = vector.broadcast %121 : vector<32x1xf32> to vector<32x63xf32>
    %123 = arith.addf %120, %122 : vector<32x63xf32>
    %cst_126 = arith.constant 0.000000e+00 : f32
    %124 = vector.broadcast %cst_126 : f32 to vector<32x63xf32>
    %125 = arith.maximumf %123, %124 : vector<32x63xf32>
    %c0_127 = arith.constant 0 : index
    %c0_128 = arith.constant 0 : index
    %126 = vector.load %arg6[%c0_127, %c0_128] : memref<63x256xf32, #tpu.memory_space<vmem>>, vector<63x256xf32>
    %cst_129 = arith.constant dense<0.000000e+00> : vector<32x256xf32>
    %127 = tpu.matmul %125, %126, %cst_129 {dimension_numbers = #tpu.dot_dimension_numbers<[1], [0], [0], [1], [0, 0, 1, 1], [], []>} : vector<32x63xf32>, vector<63x256xf32>, vector<32x256xf32> -> vector<32x256xf32>
    %c0_130 = arith.constant 0 : index
    %c0_131 = arith.constant 0 : index
    %128 = vector.load %arg7[%c0_130, %c0_131] : memref<1x256xf32, #tpu.memory_space<vmem>>, vector<1x256xf32>
    %129 = vector.broadcast %128 : vector<1x256xf32> to vector<32x256xf32>
    %130 = arith.addf %127, %129 : vector<32x256xf32>
    %cst_132 = arith.constant 0.000000e+00 : f32
    %131 = vector.broadcast %cst_132 : f32 to vector<32x256xf32>
    %132 = arith.maximumf %130, %131 : vector<32x256xf32>
    %c0_133 = arith.constant 0 : index
    %c0_134 = arith.constant 0 : index
    %133 = vector.load %arg8[%c0_133, %c0_134] : memref<256x2xf32, #tpu.memory_space<vmem>>, vector<256x2xf32>
    %cst_135 = arith.constant dense<0.000000e+00> : vector<32x2xf32>
    %134 = tpu.matmul %132, %133, %cst_135 {dimension_numbers = #tpu.dot_dimension_numbers<[1], [0], [0], [1], [0, 0, 1, 1], [], []>} : vector<32x256xf32>, vector<256x2xf32>, vector<32x2xf32> -> vector<32x2xf32>
    %c0_136 = arith.constant 0 : index
    %c0_137 = arith.constant 0 : index
    %135 = vector.load %arg9[%c0_136, %c0_137] : memref<1x2xf32, #tpu.memory_space<vmem>>, vector<1x2xf32>
    %136 = vector.broadcast %135 : vector<1x2xf32> to vector<32x2xf32>
    %137 = arith.addf %134, %136 : vector<32x2xf32>
    %c0_138 = arith.constant 0 : index
    %c0_139 = arith.constant 0 : index
    %c0_140 = arith.constant 0 : index
    %138 = vector.load %arg10[%c0_138, %c0_139, %c0_140] : memref<1x32x4xf32, #tpu.memory_space<vmem>>, vector<1x32x2xf32>
    %139 = vector.shape_cast %138 : vector<1x32x2xf32> to vector<32x2xf32>
    %140 = vector.shape_cast %137 : vector<32x2xf32> to vector<1x32x2xf32>
    tpu.vector_store %arg10[%c0_138, %c0_139, %c0_140], %140 {strides = array<i32>} : memref<1x32x4xf32, #tpu.memory_space<vmem>>, vector<1x32x2xf32>,
    %c0_141 = arith.constant 0 : index
    %c0_142 = arith.constant 0 : index
    %c0_143 = arith.constant 0 : index
    %141 = vector.load %arg4[%c0_141, %c0_142, %c0_143] : memref<4x32x64xf32, #tpu.memory_space<vmem>>, vector<1x32x64xf32>
    %142 = vector.shape_cast %141 : vector<1x32x64xf32> to vector<32x64xf32>
    %c32_144 = arith.constant 32 : index
    %c0_145 = arith.constant 0 : index
    %143 = vector.load %arg11[%c32_144, %c0_145] : memref<96x66xf32, #tpu.memory_space<vmem>>, vector<64x63xf32>
    %cst_146 = arith.constant dense<0.000000e+00> : vector<32x63xf32>
    %144 = tpu.matmul %142, %143, %cst_146 {dimension_numbers = #tpu.dot_dimension_numbers<[1], [0], [0], [1], [0, 0, 1, 1], [], []>} : vector<32x64xf32>, vector<64x63xf32>, vector<32x63xf32> -> vector<32x63xf32>
    %c1_147 = arith.constant 1 : index
    %c0_148 = arith.constant 0 : index
    %c0_149 = arith.constant 0 : index
    %145 = vector.load %arg4[%c1_147, %c0_148, %c0_149] : memref<4x32x64xf32, #tpu.memory_space<vmem>>, vector<1x32x64xf32>
    %146 = vector.shape_cast %145 : vector<1x32x64xf32> to vector<32x64xf32>
    %c32_150 = arith.constant 32 : index
    %c1_151 = arith.constant 1 : index
    %147 = vector.load %arg11[%c32_150, %c1_151] : memref<96x66xf32, #tpu.memory_space<vmem>>, vector<64x63xf32>
    %cst_152 = arith.constant dense<0.000000e+00> : vector<32x63xf32>
    %148 = tpu.matmul %146, %147, %cst_152 {dimension_numbers = #tpu.dot_dimension_numbers<[1], [0], [0], [1], [0, 0, 1, 1], [], []>} : vector<32x64xf32>, vector<64x63xf32>, vector<32x63xf32> -> vector<32x63xf32>
    %149 = arith.addf %144, %148 : vector<32x63xf32>
    %c2_153 = arith.constant 2 : index
    %c0_154 = arith.constant 0 : index
    %c0_155 = arith.constant 0 : index
    %150 = vector.load %arg4[%c2_153, %c0_154, %c0_155] : memref<4x32x64xf32, #tpu.memory_space<vmem>>, vector<1x32x64xf32>
    %151 = vector.shape_cast %150 : vector<1x32x64xf32> to vector<32x64xf32>
    %c32_156 = arith.constant 32 : index
    %c2_157 = arith.constant 2 : index
    %152 = vector.load %arg11[%c32_156, %c2_157] : memref<96x66xf32, #tpu.memory_space<vmem>>, vector<64x63xf32>
    %cst_158 = arith.constant dense<0.000000e+00> : vector<32x63xf32>
    %153 = tpu.matmul %151, %152, %cst_158 {dimension_numbers = #tpu.dot_dimension_numbers<[1], [0], [0], [1], [0, 0, 1, 1], [], []>} : vector<32x64xf32>, vector<64x63xf32>, vector<32x63xf32> -> vector<32x63xf32>
    %154 = arith.addf %149, %153 : vector<32x63xf32>
    %c3_159 = arith.constant 3 : index
    %c0_160 = arith.constant 0 : index
    %c0_161 = arith.constant 0 : index
    %155 = vector.load %arg4[%c3_159, %c0_160, %c0_161] : memref<4x32x64xf32, #tpu.memory_space<vmem>>, vector<1x32x64xf32>
    %156 = vector.shape_cast %155 : vector<1x32x64xf32> to vector<32x64xf32>
    %c32_162 = arith.constant 32 : index
    %c3_163 = arith.constant 3 : index
    %157 = vector.load %arg11[%c32_162, %c3_163] : memref<96x66xf32, #tpu.memory_space<vmem>>, vector<64x63xf32>
    %cst_164 = arith.constant dense<0.000000e+00> : vector<32x63xf32>
    %158 = tpu.matmul %156, %157, %cst_164 {dimension_numbers = #tpu.dot_dimension_numbers<[1], [0], [0], [1], [0, 0, 1, 1], [], []>} : vector<32x64xf32>, vector<64x63xf32>, vector<32x63xf32> -> vector<32x63xf32>
    %159 = arith.addf %154, %158 : vector<32x63xf32>
    %c0_165 = arith.constant 0 : index
    %c0_166 = arith.constant 0 : index
    %160 = vector.load %arg5[%c0_165, %c0_166] : memref<32x1xf32, #tpu.memory_space<vmem>>, vector<32x1xf32>
    %161 = vector.broadcast %160 : vector<32x1xf32> to vector<32x63xf32>
    %162 = arith.addf %159, %161 : vector<32x63xf32>
    %cst_167 = arith.constant 0.000000e+00 : f32
    %163 = vector.broadcast %cst_167 : f32 to vector<32x63xf32>
    %164 = arith.maximumf %162, %163 : vector<32x63xf32>
    %c0_168 = arith.constant 0 : index
    %c0_169 = arith.constant 0 : index
    %165 = vector.load %arg6[%c0_168, %c0_169] : memref<63x256xf32, #tpu.memory_space<vmem>>, vector<63x256xf32>
    %cst_170 = arith.constant dense<0.000000e+00> : vector<32x256xf32>
    %166 = tpu.matmul %164, %165, %cst_170 {dimension_numbers = #tpu.dot_dimension_numbers<[1], [0], [0], [1], [0, 0, 1, 1], [], []>} : vector<32x63xf32>, vector<63x256xf32>, vector<32x256xf32> -> vector<32x256xf32>
    %c0_171 = arith.constant 0 : index
    %c0_172 = arith.constant 0 : index
    %167 = vector.load %arg7[%c0_171, %c0_172] : memref<1x256xf32, #tpu.memory_space<vmem>>, vector<1x256xf32>
    %168 = vector.broadcast %167 : vector<1x256xf32> to vector<32x256xf32>
    %169 = arith.addf %166, %168 : vector<32x256xf32>
    %cst_173 = arith.constant 0.000000e+00 : f32
    %170 = vector.broadcast %cst_173 : f32 to vector<32x256xf32>
    %171 = arith.maximumf %169, %170 : vector<32x256xf32>
    %c0_174 = arith.constant 0 : index
    %c0_175 = arith.constant 0 : index
    %172 = vector.load %arg8[%c0_174, %c0_175] : memref<256x2xf32, #tpu.memory_space<vmem>>, vector<256x2xf32>
    %cst_176 = arith.constant dense<0.000000e+00> : vector<32x2xf32>
    %173 = tpu.matmul %171, %172, %cst_176 {dimension_numbers = #tpu.dot_dimension_numbers<[1], [0], [0], [1], [0, 0, 1, 1], [], []>} : vector<32x256xf32>, vector<256x2xf32>, vector<32x2xf32> -> vector<32x2xf32>
    %c0_177 = arith.constant 0 : index
    %c0_178 = arith.constant 0 : index
    %174 = vector.load %arg9[%c0_177, %c0_178] : memref<1x2xf32, #tpu.memory_space<vmem>>, vector<1x2xf32>
    %175 = vector.broadcast %174 : vector<1x2xf32> to vector<32x2xf32>
    %176 = arith.addf %173, %175 : vector<32x2xf32>
    %c0_179 = arith.constant 0 : index
    %c0_180 = arith.constant 0 : index
    %c2_181 = arith.constant 2 : index
    %177 = vector.load %arg10[%c0_179, %c0_180, %c2_181] : memref<1x32x4xf32, #tpu.memory_space<vmem>>, vector<1x32x2xf32>
    %178 = vector.shape_cast %177 : vector<1x32x2xf32> to vector<32x2xf32>
    %179 = vector.shape_cast %176 : vector<32x2xf32> to vector<1x32x2xf32>
    tpu.vector_store %arg10[%c0_179, %c0_180, %c2_181], %179 {strides = array<i32>} : memref<1x32x4xf32, #tpu.memory_space<vmem>>, vector<1x32x2xf32>,
    return
  }
  func.func @transform_0(%arg0: i32) -> (i32, i32, i32) {
    %c0_i32 = arith.constant 0 : i32
    %c0_i32_0 = arith.constant 0 : i32
    %c0_i32_1 = arith.constant 0 : i32
    return %arg0, %c0_i32, %c0_i32_0 : i32, i32, i32
  }
  func.func @transform_1(%arg0: i32) -> (i32, i32, i32) {
    %c0_i32 = arith.constant 0 : i32
    %c0_i32_0 = arith.constant 0 : i32
    %c0_i32_1 = arith.constant 0 : i32
    %c0_i32_2 = arith.constant 0 : i32
    return %c0_i32, %c0_i32_0, %c0_i32_1 : i32, i32, i32
  }
  func.func @transform_2(%arg0: i32) -> (i32, i32) {
    %c0_i32 = arith.constant 0 : i32
    %c0_i32_0 = arith.constant 0 : i32
    %c0_i32_1 = arith.constant 0 : i32
    return %c0_i32, %c0_i32_0 : i32, i32
  }
  func.func @transform_3(%arg0: i32) -> (i32, i32, i32) {
    %c0_i32 = arith.constant 0 : i32
    %c0_i32_0 = arith.constant 0 : i32
    %c0_i32_1 = arith.constant 0 : i32
    %c0_i32_2 = arith.constant 0 : i32
    return %c0_i32, %c0_i32_0, %c0_i32_1 : i32, i32, i32
  }
  func.func @transform_4(%arg0: i32) -> (i32, i32) {
    %c0_i32 = arith.constant 0 : i32
    %c0_i32_0 = arith.constant 0 : i32
    %c0_i32_1 = arith.constant 0 : i32
    return %c0_i32, %c0_i32_0 : i32, i32
  }
  func.func @transform_5(%arg0: i32) -> (i32, i32) {
    %c0_i32 = arith.constant 0 : i32
    %c0_i32_0 = arith.constant 0 : i32
    %c0_i32_1 = arith.constant 0 : i32
    return %c0_i32, %c0_i32_0 : i32, i32
  }
  func.func @transform_6(%arg0: i32) -> (i32, i32) {
    %c0_i32 = arith.constant 0 : i32
    %c0_i32_0 = arith.constant 0 : i32
    %c0_i32_1 = arith.constant 0 : i32
    return %c0_i32, %c0_i32_0 : i32, i32
  }
  func.func @transform_7(%arg0: i32) -> (i32, i32) {
    %c0_i32 = arith.constant 0 : i32
    %c0_i32_0 = arith.constant 0 : i32
    %c0_i32_1 = arith.constant 0 : i32
    return %c0_i32, %c0_i32_0 : i32, i32
  }
  func.func @transform_8(%arg0: i32) -> (i32, i32) {
    %c0_i32 = arith.constant 0 : i32
    %c0_i32_0 = arith.constant 0 : i32
    %c0_i32_1 = arith.constant 0 : i32
    return %c0_i32, %c0_i32_0 : i32, i32
  }
  func.func @transform_9(%arg0: i32) -> (i32, i32, i32) {
    %c0_i32 = arith.constant 0 : i32
    %c0_i32_0 = arith.constant 0 : i32
    %c0_i32_1 = arith.constant 0 : i32
    return %arg0, %c0_i32, %c0_i32_0 : i32, i32, i32
  }
}

</mosaic_0001>

<bundles_post_ra>
// kernel: dqn_forward.1
= control target key start
LH: loop header
LB: loop body
LE: loop exit
PB: predicated region body
PF: predicated region fallthrough
CT: control target
= control target key end

     0   :  { %s4704_s30 = smov 0   ;;  %s6101_s0 = inlined_call_operand.vmem [shape: f32[2,448,67], index: 0, kind: input, shape index: {}]   ;;  %s6102_s1 = inlined_call_operand.vmem [shape: f32[2,16,128], index: 1, kind: input, shape index: {}]   ;;  %s6103_s2 = inlined_call_operand.vmem [shape: f32[16,1], index: 2, kind: input, shape index: {}]   ;;  %s6104_s3 = inlined_call_operand.vmem [shape: f32[4,32,64], index: 3, kind: input, shape index: {}]   ;;  %s6105_s4 = inlined_call_operand.vmem [shape: f32[32,1], index: 4, kind: input, shape index: {}]   ;;  %s6106_s5 = inlined_call_operand.vmem [shape: f32[63,256], index: 5, kind: input, shape index: {}]   ;;  %s6107_s6 = inlined_call_operand.vmem [shape: f32[1,256], index: 6, kind: input, shape index: {}]   ;;  %s6108_s7 = inlined_call_operand.vmem [shape: f32[256,2], index: 7, kind: input, shape index: {}]   ;;  %s6109_s8 = inlined_call_operand.vmem [shape: f32[1,2], index: 8, kind: input, shape index: {}]   ;;  %s6110_s9 = inlined_call_operand.vmem [shape: f32[2,32,4], index: 9, kind: output, shape index: {}]  }
   0x1 LB: > { %s3532_s10 = sadd.s32 4294967295, %s4646_s30   ;;  %p3536_p0 = scmp.ge.s32.totalorder %s4646_s30, 1  ;;  %s4646_s30 = sphi %s4704_s30, %s19_s30  }
   0x2   : > { %p287_p1 = scmp.lt.s32.totalorder %s4646_s30, 3 }
   0x4   : > { %p288_p2 = pnand %p3536_p0, %p287_p1 }
   0x6   : > { %291 = sbr.rel (%p288_p2) target bundleno = 1786 (0x6fa), region = 56 }
   0xb   : > { %p323_p3 = scmp.lt.s32.totalorder %s3532_s10, 1  ;;  %s4648_s15 = smov 127   ;;  %v4783_v12 = vld [vmem:[%s6102_s1] sm:$0xff]  ;;  %v4790_v13 = vld [vmem:[%s6102_s1 + $0x10] sm:$0xff]  ;;  %v4837_v24 = vld [vmem:[%s6102_s1 + $0x8] sm:$0xff]  ;;  %v4649_v35 = vmov 0  }
   0xc   : > { %4092 = vmatprep.mubr.f32.mxu1 %v4783_v12  ;;  %4057 = vmatprep.mubr.f32.mxu0 %v4790_v13  ;;  %v5045_v52 = vld [vmem:[%s6103_s2] sm:$0xff]  ;;  %v1326_v53 = vld [vmem:[%s6103_s2 + $0x8] sm:$0xff]  ;;  %v5069_v63 = vld [vmem:[%s6102_s1 + $0x18] sm:$0xff]  ;;  %vm584_vm0 = vcmask 539648   ;;  %s4650_s28 = smov 126   ;;  %vm1896_vm1 = vcmask 523264  }
   0xd   : > { %s6220_s10 = smov (!%p323_p3, %s3532_s10), 1  ;;  %4637 = vset.pattern.permute.xlu1 %v4649_v35  ;;  %4636 = vset.pattern.permute.xlu0 %v4649_v35  ;;  %s4651_s19 = smov 125   ;;  %vm2424_vm2 = vcmask 1046528   ;;  %vm2411_vm3 = vcmask 515072   ;;  %vm2652_vm4 = vcmask 15360   ;;  %vm3472_vm5 = vcmask 31760  }
   0xe   : > { %s4621_s11 = smul.u32 448, %s6220_s10  ;;  %s3624_s18 = sshll.u32 %s6220_s10, 5 }
   0xf   : > { %s6062_s24 = scalar_lea.vmem %s6110_s9, %s3624_s18  ;;  %s4653_s26 = smov 2  }
  0x10   : > { %s4718_s14 = scalar_lea.vmem %s6101_s0, %s4621_s11 }
  0x11   : > { %v4721_v0 = vld [vmem:[%s4718_s14 + $0x78] sm:$0xff]  ;;  %v4724_v1 = vld [vmem:[%s4718_s14 + $0x68] sm:$0xff]  ;;  %v4731_v2 = vld [vmem:[%s4718_s14 + $0x70] sm:$0xff] }
  0x12   : > { %400 = vrot.lane.b32.xlu0 %v4721_v0, %s4648_s15  ;;  %396 = vrot.lane.b32.xlu1 %v4724_v1, %s4648_s15  ;;  %v4734_v3 = vld [vmem:[%s4718_s14 + $0x60] sm:$0xff]  ;;  %v4744_v4 = vld [vmem:[%s4718_s14 + $0x58] sm:$0xff] }
  0x13   : > { %4060 = vmatprep.subr.mxu1 %v4721_v0  ;;  %v4747_v5 = vld [vmem:[%s4718_s14 + $0x50] sm:$0xff]  ;;  %v4757_v6 = vld [vmem:[%s4718_s14 + $0x48] sm:$0xff]  ;;  %v4760_v7 = vld [vmem:[%s4718_s14 + $0x40] sm:$0xff] }
  0x14   : > { %4061 = vmatpush3.msra.mxu1 %v4721_v0  ;;  %v342_v8 = vld [vmem:[%s4718_s14 + $0x38] sm:$0xff]  ;;  %v341_v9 = vld [vmem:[%s4718_s14 + $0x30] sm:$0xff]  ;;  %v340_v10 = vld [vmem:[%s4718_s14 + $0x28] sm:$0xff] }
  0x15   : > { %4062 = vmatprep.subr.mxu1 %v4731_v2  ;;  %v339_v11 = vld [vmem:[%s4718_s14 + $0x20] sm:$0xff]  ;;  %v338_v14 = vld [vmem:[%s4718_s14 + $0x18] sm:$0xff]  ;;  %v337_v15 = vld [vmem:[%s4718_s14 + $0x10] sm:$0xff] }
  0x16   : > { %398 = vrot.lane.b32.xlu0 %v4731_v2, %s4648_s15  ;;  %394 = vrot.lane.b32.xlu1 %v4734_v3, %s4648_s15  ;;  %v336_v16 = vld [vmem:[%s4718_s14 + $0x8] sm:$0xff]  ;;  %v335_v17 = vld [vmem:[%s4718_s14] sm:$0xff] }
  0x17   : > { %4063 = vmatpush3.msra.mxu1 %v4731_v2  ;;  %v4805_v18 = vld [vmem:[%s4718_s14 + $0xb8] sm:$0xff]  ;;  %v4808_v19 = vld [vmem:[%s4718_s14 + $0xb0] sm:$0xff]  ;;  %v4815_v20 = vld [vmem:[%s4718_s14 + $0xa8] sm:$0xff] }
  0x18   : > { %4064 = vmatprep.subr.mxu1 %v4724_v1  ;;  %v4818_v21 = vld [vmem:[%s4718_s14 + $0xa0] sm:$0xff]  ;;  %v4825_v22 = vld [vmem:[%s4718_s14 + $0x98] sm:$0xff]  ;;  %v4828_v23 = vld [vmem:[%s4718_s14 + $0x90] sm:$0xff] }
  0x19   : > { %4065 = vmatpush3.msra.mxu1 %v4724_v1  ;;  %v4840_v25 = vld [vmem:[%s4718_s14 + $0x88] sm:$0xff]  ;;  %v4843_v26 = vld [vmem:[%s4718_s14 + $0x80] sm:$0xff]  ;;  %v4881_v27 = vld [vmem:[%s4718_s14 + $0xf8] sm:$0xff] }
  0x1a   : > { %392 = vrot.lane.b32.xlu0 %v4744_v4, %s4648_s15  ;;  %390 = vrot.lane.b32.xlu1 %v4747_v5, %s4648_s15  ;;  %v4884_v28 = vld [vmem:[%s4718_s14 + $0xf0] sm:$0xff]  ;;  %v4894_v29 = vld [vmem:[%s4718_s14 + $0xe8] sm:$0xff] }
  0x1b   : > { %4066 = vmatprep.subr.mxu1 %v4734_v3  ;;  %v4897_v30 = vld [vmem:[%s4718_s14 + $0xe0] sm:$0xff]  ;;  %v4907_v31 = vld [vmem:[%s4718_s14 + $0xd8] sm:$0xff]  ;;  %v4910_v32 = vld [vmem:[%s4718_s14 + $0xd0] sm:$0xff] }
  0x1c   : > { %4067 = vmatpush3.msra.mxu1 %v4734_v3  ;;  %v4920_v33 = vld [vmem:[%s4718_s14 + $0xc8] sm:$0xff]  ;;  %v4923_v34 = vld [vmem:[%s4718_s14 + $0xc0] sm:$0xff]  ;;  %v4963_v36 = vld [vmem:[%s4718_s14 + $0x138] sm:$0xff] }
  0x1d   : > { %4068 = vmatprep.subr.mxu1 %v4744_v4  ;;  %v4966_v37 = vld [vmem:[%s4718_s14 + $0x130] sm:$0xff]  ;;  %v4976_v38 = vld [vmem:[%s4718_s14 + $0x128] sm:$0xff]  ;;  %v4979_v39 = vld [vmem:[%s4718_s14 + $0x120] sm:$0xff] }
  0x1e   : > { %388 = vrot.lane.b32.xlu0 %v4757_v6, %s4648_s15  ;;  %386 = vrot.lane.b32.xlu1 %v4760_v7, %s4648_s15  ;;  %v4989_v40 = vld [vmem:[%s4718_s14 + $0x118] sm:$0xff]  ;;  %v4992_v41 = vld [vmem:[%s4718_s14 + $0x110] sm:$0xff] }
  0x1f   : > { %4069 = vmatpush3.msra.mxu1 %v4744_v4  ;;  %v5002_v42 = vld [vmem:[%s4718_s14 + $0x108] sm:$0xff]  ;;  %v5005_v43 = vld [vmem:[%s4718_s14 + $0x100] sm:$0xff] }
  0x20   : > { %4070 = vmatprep.subr.mxu1 %v4747_v5 }
  0x21   : > { %4071 = vmatpush3.msra.mxu1 %v4747_v5 }
  0x22   : > { %384 = vrot.lane.b32.xlu0 %v342_v8, %s4648_s15  ;;  %382 = vrot.lane.b32.xlu1 %v341_v9, %s4648_s15 }
  0x23   : > { %4072 = vmatprep.subr.mxu1 %v4757_v6 }
  0x24   : > { %4073 = vmatpush3.msra.mxu1 %v4757_v6 }
  0x25   : > { %4074 = vmatprep.subr.mxu1 %v4760_v7 }
  0x26   : > { %380 = vrot.lane.b32.xlu0 %v340_v10, %s4648_s15  ;;  %378 = vrot.lane.b32.xlu1 %v339_v11, %s4648_s15 }
  0x27   : > { %4075 = vmatpush3.msra.mxu1 %v4760_v7 }
  0x28   : > { %4076 = vmatprep.subr.mxu1 %v342_v8 }
  0x29   : > { %4077 = vmatpush3.msra.mxu1 %v342_v8 }
  0x2a   : > { %376 = vrot.lane.b32.xlu0 %v338_v14, %s4648_s15  ;;  %374 = vrot.lane.b32.xlu1 %v337_v15, %s4648_s15 }
  0x2b   : > { %4078 = vmatprep.subr.mxu1 %v341_v9 }
  0x2c   : > { %4079 = vmatpush3.msra.mxu1 %v341_v9 }
  0x2d   : > { %4080 = vmatprep.subr.mxu1 %v340_v10 }
  0x2e   : > { %372 = vrot.lane.b32.xlu0 %v336_v16, %s4648_s15  ;;  %370 = vrot.lane.b32.xlu1 %v335_v17, %s4648_s15 }
  0x2f   : > { %4081 = vmatpush3.msra.mxu1 %v340_v10 }
  0x30   : > { %4082 = vmatprep.subr.mxu1 %v339_v11 }
  0x31   : > { %4083 = vmatpush3.msra.mxu1 %v339_v11 }
  0x32   : > { %653 = vrot.lane.b32.xlu0 %v4805_v18, %s4648_s15  ;;  %651 = vrot.lane.b32.xlu1 %v4808_v19, %s4648_s15 }
  0x33   : > { %4084 = vmatprep.subr.mxu1 %v338_v14 }
  0x34   : > { %4085 = vmatpush3.msra.mxu1 %v338_v14 }
  0x35   : > { %4086 = vmatprep.subr.mxu1 %v337_v15 }
  0x36   : > { %649 = vrot.lane.b32.xlu0 %v4815_v20, %s4648_s15  ;;  %647 = vrot.lane.b32.xlu1 %v4818_v21, %s4648_s15 }
  0x37   : > { %4087 = vmatpush3.msra.mxu1 %v337_v15  ;;  %v5098_v15 = vld [vmem:[%s4718_s14 + $0x178] sm:$0xff] }
  0x38   : > { %4088 = vmatprep.subr.mxu1 %v336_v16 }
  0x39   : > { %4089 = vmatpush3.msra.mxu1 %v336_v16  ;;  %v5102_v16 = vld [vmem:[%s4718_s14 + $0x170] sm:$0xff] }
  0x3a   : > { %645 = vrot.lane.b32.xlu0 %v4825_v22, %s4648_s15  ;;  %643 = vrot.lane.b32.xlu1 %v4828_v23, %s4648_s15 }
  0x3b   : > { %4090 = vmatprep.subr.mxu1 %v335_v17 }
  0x3c   : > { %4091 = vmatpush3.msra.mxu1 %v335_v17 }
  0x3d   : > { %4130 = vmatprep.subr.mxu1 %v4805_v18  ;;  %4093 = vmatmul.mubr.f32.vlgmr.msra.gmra.mxu1 %v4837_v24 }
  0x3e   : > { %641 = vrot.lane.b32.xlu0 %v4840_v25, %s4648_s15  ;;  %639 = vrot.lane.b32.xlu1 %v4843_v26, %s4648_s15 }
  0x3f   : > { %4131 = vmatpush3.msra.mxu1 %v4805_v18  ;;  %4162 = vmatprep.mubr.f32.mxu1 %v4783_v12 }
  0x40   : > { %4132 = vmatprep.subr.mxu1 %v4808_v19 }
  0x41   : > { %4133 = vmatpush3.msra.mxu1 %v4808_v19 }
  0x42   : > { %637 = vrot.lane.b32.xlu0 %v4721_v0, %s4648_s15  ;;  %635 = vrot.lane.b32.xlu1 %v4731_v2, %s4648_s15 }
  0x43   : > { %4134 = vmatprep.subr.mxu1 %v4815_v20 }
  0x44   : > { %4135 = vmatpush3.msra.mxu1 %v4815_v20 }
  0x45   : > { %4136 = vmatprep.subr.mxu1 %v4818_v21 }
  0x46   : > { %633 = vrot.lane.b32.xlu0 %v4724_v1, %s4648_s15  ;;  %631 = vrot.lane.b32.xlu1 %v4734_v3, %s4648_s15 }
  0x47   : > { %4137 = vmatpush3.msra.mxu1 %v4818_v21 }
  0x48   : > { %4138 = vmatprep.subr.mxu1 %v4825_v22 }
  0x49   : > { %4139 = vmatpush3.msra.mxu1 %v4825_v22 }
  0x4a   : > { %629 = vrot.lane.b32.xlu0 %v4744_v4, %s4648_s15  ;;  %627 = vrot.lane.b32.xlu1 %v4747_v5, %s4648_s15 }
  0x4b   : > { %4140 = vmatprep.subr.mxu1 %v4828_v23 }
  0x4c   : > { %4141 = vmatpush3.msra.mxu1 %v4828_v23 }
  0x4d   : > { %4142 = vmatprep.subr.mxu1 %v4840_v25 }
  0x4e   : > { %625 = vrot.lane.b32.xlu0 %v4757_v6, %s4648_s15  ;;  %623 = vrot.lane.b32.xlu1 %v4760_v7, %s4648_s15 }
  0x4f   : > { %4143 = vmatpush3.msra.mxu1 %v4840_v25 }
  0x50   : > { %4144 = vmatprep.subr.mxu1 %v4843_v26 }
  0x51   : > { %4145 = vmatpush3.msra.mxu1 %v4843_v26 }
  0x52   : > { %905 = vrot.lane.b32.xlu0 %v4881_v27, %s4648_s15  ;;  %903 = vrot.lane.b32.xlu1 %v4884_v28, %s4648_s15 }
  0x53   : > { %4146 = vmatprep.subr.mxu1 %v4721_v0 }
  0x54   : > { %4147 = vmatpush3.msra.mxu1 %v4721_v0 }
  0x55   : > { %4148 = vmatprep.subr.mxu1 %v4731_v2 }
  0x56   : > { %901 = vrot.lane.b32.xlu0 %v4894_v29, %s4648_s15  ;;  %899 = vrot.lane.b32.xlu1 %v4897_v30, %s4648_s15 }
  0x57   : > { %4149 = vmatpush3.msra.mxu1 %v4731_v2 }
  0x58   : > { %4150 = vmatprep.subr.mxu1 %v4724_v1 }
  0x59   : > { %4151 = vmatpush3.msra.mxu1 %v4724_v1 }
  0x5a   : > { %897 = vrot.lane.b32.xlu0 %v4907_v31, %s4648_s15  ;;  %895 = vrot.lane.b32.xlu1 %v4910_v32, %s4648_s15 }
  0x5b   : > { %4152 = vmatprep.subr.mxu1 %v4734_v3 }
  0x5c   : > { %4153 = vmatpush3.msra.mxu1 %v4734_v3 }
  0x5d   : > { %4154 = vmatprep.subr.mxu1 %v4744_v4 }
  0x5e   : > { %893 = vrot.lane.b32.xlu0 %v4920_v33, %s4648_s15  ;;  %891 = vrot.lane.b32.xlu1 %v4923_v34, %s4648_s15 }
  0x5f   : > { %4155 = vmatpush3.msra.mxu1 %v4744_v4 }
  0x60   : > { %4156 = vmatprep.subr.mxu1 %v4747_v5 }
  0x61   : > { %4157 = vmatpush3.msra.mxu1 %v4747_v5 }
  0x62   : > { %889 = vrot.lane.b32.xlu0 %v4805_v18, %s4648_s15  ;;  %887 = vrot.lane.b32.xlu1 %v4808_v19, %s4648_s15 }
  0x63   : > { %4158 = vmatprep.subr.mxu1 %v4757_v6 }
  0x64   : > { %4159 = vmatpush3.msra.mxu1 %v4757_v6 }
  0x65   : > { %4160 = vmatprep.subr.mxu1 %v4760_v7 }
  0x66   : > { %885 = vrot.lane.b32.xlu0 %v4815_v20, %s4648_s15  ;;  %883 = vrot.lane.b32.xlu1 %v4818_v21, %s4648_s15 }
  0x67   : > { %4161 = vmatpush3.msra.mxu1 %v4760_v7 }
  0x68   : > { %4200 = vmatprep.subr.mxu1 %v4881_v27  ;;  %4163 = vmatmul.mubr.f32.vlgmr.msra.gmra.mxu1 %v4837_v24 }
  0x69   : > { %4201 = vmatpush3.msra.mxu1 %v4881_v27  ;;  %4232 = vmatprep.mubr.f32.mxu1 %v4783_v12 }
  0x6a   : > { %881 = vrot.lane.b32.xlu0 %v4825_v22, %s4648_s15  ;;  %879 = vrot.lane.b32.xlu1 %v4828_v23, %s4648_s15 }
  0x6b   : > { %4202 = vmatprep.subr.mxu1 %v4884_v28 }
  0x6c   : > { %4203 = vmatpush3.msra.mxu1 %v4884_v28 }
  0x6d   : > { %4204 = vmatprep.subr.mxu1 %v4894_v29 }
  0x6e   : > { %877 = vrot.lane.b32.xlu0 %v4840_v25, %s4648_s15  ;;  %875 = vrot.lane.b32.xlu1 %v4843_v26, %s4648_s15 }
  0x6f   : > { %4205 = vmatpush3.msra.mxu1 %v4894_v29 }
  0x70   : > { %4206 = vmatprep.subr.mxu1 %v4897_v30 }
  0x71   : > { %4207 = vmatpush3.msra.mxu1 %v4897_v30 }
  0x72   : > { %1157 = vrot.lane.b32.xlu0 %v4963_v36, %s4648_s15  ;;  %1155 = vrot.lane.b32.xlu1 %v4966_v37, %s4648_s15 }
  0x73   : > { %4208 = vmatprep.subr.mxu1 %v4907_v31 }
  0x74   : > { %4209 = vmatpush3.msra.mxu1 %v4907_v31 }
  0x75   : > { %4210 = vmatprep.subr.mxu1 %v4910_v32 }
  0x76   : > { %1153 = vrot.lane.b32.xlu0 %v4976_v38, %s4648_s15  ;;  %1151 = vrot.lane.b32.xlu1 %v4979_v39, %s4648_s15 }
  0x77   : > { %4211 = vmatpush3.msra.mxu1 %v4910_v32 }
  0x78   : > { %4212 = vmatprep.subr.mxu1 %v4920_v33 }
  0x79   : > { %4213 = vmatpush3.msra.mxu1 %v4920_v33 }
  0x7a   : > { %1149 = vrot.lane.b32.xlu0 %v4989_v40, %s4648_s15  ;;  %1147 = vrot.lane.b32.xlu1 %v4992_v41, %s4648_s15 }
  0x7b   : > { %4214 = vmatprep.subr.mxu1 %v4923_v34 }
  0x7c   : > { %4215 = vmatpush3.msra.mxu1 %v4923_v34 }
  0x7d   : > { %4216 = vmatprep.subr.mxu1 %v4805_v18 }
  0x7e   : > { %1145 = vrot.lane.b32.xlu0 %v5002_v42, %s4648_s15  ;;  %1143 = vrot.lane.b32.xlu1 %v5005_v43, %s4648_s15 }
  0x7f   : > { %4217 = vmatpush3.msra.mxu1 %v4805_v18 }
  0x80   : > { %4218 = vmatprep.subr.mxu1 %v4808_v19 }
  0x81   : > { %4219 = vmatpush3.msra.mxu1 %v4808_v19  ;;  %v5110_v19 = vld [vmem:[%s4718_s14 + $0x168] sm:$0xff] }
  0x82   : > { %1141 = vrot.lane.b32.xlu0 %v4881_v27, %s4648_s15  ;;  %1139 = vrot.lane.b32.xlu1 %v4884_v28, %s4648_s15 }
  0x83   : > { %4220 = vmatprep.subr.mxu1 %v4815_v20 }
  0x84   : > { %v401_v44 = vpop.permute.xlu0 %400  ;;  %v397_v45 = vpop.permute.xlu1 %396  ;;  %4221 = vmatpush3.msra.mxu1 %v4815_v20  ;;  %v5113_v20 = vld [vmem:[%s4718_s14 + $0x160] sm:$0xff] }
  0x85   : > { %4025 = vmatprep.subr.mxu0 %v401_v44  ;;  %4222 = vmatprep.subr.mxu1 %v4818_v21 }
  0x86   : > { %4026 = vmatpush3.msra.mxu0 %v401_v44  ;;  %1137 = vrot.lane.b32.xlu0 %v4894_v29, %s4648_s15 }
  0x87   : > { %1135 = vrot.lane.b32.xlu1 %v4897_v30, %s4648_s15  ;;  %4223 = vmatpush3.msra.mxu1 %v4818_v21 }
  0x88   : > { %v399_v46 = vpop.permute.xlu0 %398  ;;  %v395_v47 = vpop.permute.xlu1 %394  ;;  %4224 = vmatprep.subr.mxu1 %v4825_v22 }
  0x89   : > { %4027 = vmatprep.subr.mxu0 %v399_v46  ;;  %4225 = vmatpush3.msra.mxu1 %v4825_v22 }
  0x8a   : > { %4028 = vmatpush3.msra.mxu0 %v399_v46  ;;  %1133 = vrot.lane.b32.xlu0 %v4907_v31, %s4648_s15 }
  0x8b   : > { %4029 = vmatprep.subr.mxu0 %v397_v45  ;;  %1131 = vrot.lane.b32.xlu1 %v4910_v32, %s4648_s15 }
  0x8c   : > { %4030 = vmatpush3.msra.mxu0 %v397_v45  ;;  %v393_v48 = vpop.permute.xlu0 %392  ;;  %v391_v49 = vpop.permute.xlu1 %390  ;;  %4226 = vmatprep.subr.mxu1 %v4828_v23 }
  0x8d   : > { %4031 = vmatprep.subr.mxu0 %v395_v47  ;;  %4227 = vmatpush3.msra.mxu1 %v4828_v23  ;;  %v5122_v23 = vld [vmem:[%s4718_s14 + $0x158] sm:$0xff] }
  0x8e   : > { %4032 = vmatpush3.msra.mxu0 %v395_v47  ;;  %1129 = vrot.lane.b32.xlu0 %v4920_v33, %s4648_s15 }
  0x8f   : > { %4033 = vmatprep.subr.mxu0 %v393_v48  ;;  %1127 = vrot.lane.b32.xlu1 %v4923_v34, %s4648_s15 }
  0x90   : > { %4034 = vmatpush3.msra.mxu0 %v393_v48  ;;  %v389_v50 = vpop.permute.xlu0 %388  ;;  %v387_v51 = vpop.permute.xlu1 %386  ;;  %4228 = vmatprep.subr.mxu1 %v4840_v25 }
  0x91   : > { %4035 = vmatprep.subr.mxu0 %v391_v49  ;;  %4229 = vmatpush3.msra.mxu1 %v4840_v25  ;;  %v5126_v25 = vld [vmem:[%s4718_s14 + $0x150] sm:$0xff] }
  0x92   : > { %4036 = vmatpush3.msra.mxu0 %v391_v49  ;;  %4230 = vmatprep.subr.mxu1 %v4843_v26 }
  0x93   : > { %4037 = vmatprep.subr.mxu0 %v389_v50  ;;  %1329 = vperm.xlu1 %4637, %v5045_v52  }
  0x94   : > { %4038 = vmatpush3.msra.mxu0 %v389_v50  ;;  %v385_v54 = vpop.permute.xlu0 %384  ;;  %v383_v55 = vpop.permute.xlu1 %382  ;;  %1334 = vperm.xlu0 %4636, %v1326_v53  }
  0x95   : > { %4039 = vmatprep.subr.mxu0 %v387_v51  ;;  %4231 = vmatpush3.msra.mxu1 %v4843_v26 }
  0x96   : > { %4040 = vmatpush3.msra.mxu0 %v387_v51  ;;  %4270 = vmatprep.subr.mxu1 %v4963_v36 }
  0x97   : > { %4041 = vmatprep.subr.mxu0 %v385_v54  ;;  %1082 = vperm.xlu1 %4637, %v1326_v53  }
  0x98   : > { %4042 = vmatpush3.msra.mxu0 %v385_v54  ;;  %v381_v56 = vpop.permute.xlu0 %380  ;;  %v379_v57 = vpop.permute.xlu1 %378  ;;  %4233 = vmatmul.mubr.f32.vlgmr.msra.gmra.mxu1 %v4837_v24 }
  0x99   : > { %4043 = vmatprep.subr.mxu0 %v383_v55  ;;  %4271 = vmatpush3.msra.mxu1 %v4963_v36 }
  0x9a   : > { %4044 = vmatpush3.msra.mxu0 %v383_v55  ;;  %4272 = vmatprep.subr.mxu1 %v4966_v37  ;;  %v1612_v55 = vld [vmem:[%s4718_s14 + $0x1b8] sm:$0xff] }
  0x9b   : > { %4045 = vmatprep.subr.mxu0 %v381_v56  ;;  %1077 = vperm.xlu0 %4636, %v5045_v52  }
  0x9c   : > { %4046 = vmatpush3.msra.mxu0 %v381_v56  ;;  %v377_v58 = vpop.permute.xlu0 %376  ;;  %v375_v59 = vpop.permute.xlu1 %374  ;;  %4273 = vmatpush3.msra.mxu1 %v4966_v37  ;;  %v1611_v56 = vld [vmem:[%s4718_s14 + $0x1b0] sm:$0xff] }
  0x9d   : > { %4047 = vmatprep.subr.mxu0 %v379_v57  ;;  %4274 = vmatprep.subr.mxu1 %v4976_v38 }
  0x9e   : > { %4048 = vmatpush3.msra.mxu0 %v379_v57  ;;  %830 = vperm.xlu1 %4637, %v1326_v53  }
  0x9f   : > { %4049 = vmatprep.subr.mxu0 %v377_v58  ;;  %4275 = vmatpush3.msra.mxu1 %v4976_v38 }
  0xa0   : > { %4050 = vmatpush3.msra.mxu0 %v377_v58  ;;  %v373_v60 = vpop.permute.xlu0 %372  ;;  %v371_v61 = vpop.permute.xlu1 %370  ;;  %4276 = vmatprep.subr.mxu1 %v4979_v39  ;;  %v1610_v58 = vld [vmem:[%s4718_s14 + $0x1a8] sm:$0xff] }
  0xa1   : > { %4051 = vmatprep.subr.mxu0 %v375_v59  ;;  %825 = vperm.xlu0 %4636, %v5045_v52  }
  0xa2   : > { %4052 = vmatpush3.msra.mxu0 %v375_v59  ;;  %4277 = vmatpush3.msra.mxu1 %v4979_v39  ;;  %v1609_v59 = vld [vmem:[%s4718_s14 + $0x1a0] sm:$0xff] }
  0xa3   : > { %4053 = vmatprep.subr.mxu0 %v373_v60  ;;  %4278 = vmatprep.subr.mxu1 %v4989_v40 }
  0xa4   : > { %4054 = vmatpush3.msra.mxu0 %v373_v60  ;;  %v654_v62 = vpop.permute.xlu0 %653  ;;  %v652_v0 = vpop.permute.xlu1 %651  ;;  %577 = vperm.xlu1 %4637, %v1326_v53   ;;  %v1608_v60 = vld [vmem:[%s4718_s14 + $0x198] sm:$0xff] }
  0xa5   : > { %4055 = vmatprep.subr.mxu0 %v371_v61  ;;  %4279 = vmatpush3.msra.mxu1 %v4989_v40 }
  0xa6   : > { %4056 = vmatpush3.msra.mxu0 %v371_v61  ;;  %4280 = vmatprep.subr.mxu1 %v4992_v41  ;;  %v1607_v61 = vld [vmem:[%s4718_s14 + $0x190] sm:$0xff] }
  0xa7   : > { %4058 = vmatmul.mubr.f32.vlgmr.msra.gmra.mxu0 %v5069_v63  ;;  %4095 = vmatprep.subr.mxu0 %v654_v62 }
  0xa8   : > { %4096 = vmatpush3.msra.mxu0 %v654_v62  ;;  %v650_v1 = vpop.permute.xlu0 %649  ;;  %v648_v2 = vpop.permute.xlu1 %647  ;;  %4127 = vmatprep.mubr.f32.mxu0 %v4790_v13  ;;  %v1605_v62 = vld [vmem:[%s4718_s14 + $0x180] sm:$0xff] }
  0xa9   : > { %4097 = vmatprep.subr.mxu0 %v652_v0  ;;  %572 = vperm.xlu0 %4636, %v5045_v52  }
  0xaa   : > { %4098 = vmatpush3.msra.mxu0 %v652_v0  ;;  %4281 = vmatpush3.msra.mxu1 %v4992_v41 }
  0xab   : > { %4099 = vmatprep.subr.mxu0 %v650_v1  ;;  %4282 = vmatprep.subr.mxu1 %v5002_v42 }
  0xac   : > { %4100 = vmatpush3.msra.mxu0 %v650_v1  ;;  %v646_v3 = vpop.permute.xlu0 %645  ;;  %v644_v4 = vpop.permute.xlu1 %643  ;;  %4283 = vmatpush3.msra.mxu1 %v5002_v42 }
  0xad   : > { %4101 = vmatprep.subr.mxu0 %v648_v2  ;;  %4284 = vmatprep.subr.mxu1 %v5005_v43 }
  0xae   : > { %4102 = vmatpush3.msra.mxu0 %v648_v2  ;;  %4285 = vmatpush3.msra.mxu1 %v5005_v43 }
  0xaf   : > { %4103 = vmatprep.subr.mxu0 %v646_v3  ;;  %4286 = vmatprep.subr.mxu1 %v4881_v27 }
  0xb0   : > { %4104 = vmatpush3.msra.mxu0 %v646_v3  ;;  %v642_v5 = vpop.permute.xlu0 %641  ;;  %v640_v6 = vpop.permute.xlu1 %639  ;;  %4287 = vmatpush3.msra.mxu1 %v4881_v27 }
  0xb1   : > { %4105 = vmatprep.subr.mxu0 %v644_v4  ;;  %4288 = vmatprep.subr.mxu1 %v4884_v28 }
  0xb2   : > { %4106 = vmatpush3.msra.mxu0 %v644_v4  ;;  %4289 = vmatpush3.msra.mxu1 %v4884_v28  ;;  %v5134_v28 = vld [vmem:[%s4718_s14 + $0x148] sm:$0xff] }
  0xb3   : > { %4107 = vmatprep.subr.mxu0 %v642_v5  ;;  %4290 = vmatprep.subr.mxu1 %v4894_v29 }
  0xb4   : > { %4108 = vmatpush3.msra.mxu0 %v642_v5  ;;  %v638_v7 = vpop.permute.xlu0 %637  ;;  %v636_v8 = vpop.permute.xlu1 %635  ;;  %4291 = vmatpush3.msra.mxu1 %v4894_v29  ;;  %v5137_v29 = vld [vmem:[%s4718_s14 + $0x140] sm:$0xff] }
  0xb5   : > { %4109 = vmatprep.subr.mxu0 %v640_v6  ;;  %4292 = vmatprep.subr.mxu1 %v4897_v30 }
  0xb6   : > { %4110 = vmatpush3.msra.mxu0 %v640_v6  ;;  %4293 = vmatpush3.msra.mxu1 %v4897_v30 }
  0xb7   : > { %4111 = vmatprep.subr.mxu0 %v638_v7  ;;  %4294 = vmatprep.subr.mxu1 %v4907_v31 }
  0xb8   : > { %4112 = vmatpush3.msra.mxu0 %v638_v7  ;;  %v634_v9 = vpop.permute.xlu0 %633  ;;  %v632_v10 = vpop.permute.xlu1 %631  ;;  %4295 = vmatpush3.msra.mxu1 %v4907_v31 }
  0xb9   : > { %4113 = vmatprep.subr.mxu0 %v636_v8  ;;  %4296 = vmatprep.subr.mxu1 %v4910_v32 }
  0xba   : > { %4114 = vmatpush3.msra.mxu0 %v636_v8  ;;  %4297 = vmatpush3.msra.mxu1 %v4910_v32 }
  0xbb   : > { %4115 = vmatprep.subr.mxu0 %v634_v9  ;;  %4298 = vmatprep.subr.mxu1 %v4920_v33 }
  0xbc   : > { %4116 = vmatpush3.msra.mxu0 %v634_v9  ;;  %v630_v11 = vpop.permute.xlu0 %629  ;;  %v628_v14 = vpop.permute.xlu1 %627  ;;  %4299 = vmatpush3.msra.mxu1 %v4920_v33 }
  0xbd   : > { %4117 = vmatprep.subr.mxu0 %v632_v10  ;;  %4300 = vmatprep.subr.mxu1 %v4923_v34 }
  0xbe   : > { %4118 = vmatpush3.msra.mxu0 %v632_v10  ;;  %4301 = vmatpush3.msra.mxu1 %v4923_v34 }
  0xbf   : > { %4119 = vmatprep.subr.mxu0 %v630_v11  ;;  %4302 = vmatprep.mubr.f32.mxu1 %v4783_v12 }
  0xc0   : > { %4120 = vmatpush3.msra.mxu0 %v630_v11  ;;  %v626_v17 = vpop.permute.xlu0 %625  ;;  %v624_v18 = vpop.permute.xlu1 %623  ;;  %4303 = vmatmul.mubr.f32.vlgmr.msra.gmra.mxu1 %v4837_v24 }
  0xc1   : > { %4121 = vmatprep.subr.mxu0 %v628_v14  ;;  %1409 = vrot.lane.b32.xlu1 %v5098_v15, %s4648_s15 }
  0xc2   : > { %4122 = vmatpush3.msra.mxu0 %v628_v14  ;;  %1407 = vrot.lane.b32.xlu0 %v5102_v16, %s4648_s15 }
  0xc3   : > { %4123 = vmatprep.subr.mxu0 %v626_v17  ;;  %4340 = vmatprep.subr.mxu1 %v5098_v15 }
  0xc4   : > { %4124 = vmatpush3.msra.mxu0 %v626_v17  ;;  %v906_v21 = vpop.permute.xlu0 %905  ;;  %v904_v22 = vpop.permute.xlu1 %903  ;;  %4341 = vmatpush3.msra.mxu1 %v5098_v15 }
  0xc5   : > { %4125 = vmatprep.subr.mxu0 %v624_v18  ;;  %1405 = vrot.lane.b32.xlu1 %v5110_v19, %s4648_s15 }
  0xc6   : > { %4126 = vmatpush3.msra.mxu0 %v624_v18  ;;  %1403 = vrot.lane.b32.xlu0 %v5113_v20, %s4648_s15 }
  0xc7   : > { %4128 = vmatmul.mubr.f32.vlgmr.msra.gmra.mxu0 %v5069_v63  ;;  %4165 = vmatprep.subr.mxu0 %v906_v21 }
  0xc8   : > { %4166 = vmatpush3.msra.mxu0 %v906_v21  ;;  %v902_v26 = vpop.permute.xlu0 %901  ;;  %v900_v27 = vpop.permute.xlu1 %899  ;;  %4197 = vmatprep.mubr.f32.mxu0 %v4790_v13 }
  0xc9   : > { %4167 = vmatprep.subr.mxu0 %v904_v22  ;;  %1401 = vrot.lane.b32.xlu1 %v5122_v23, %s4648_s15 }
  0xca   : > { %4168 = vmatpush3.msra.mxu0 %v904_v22  ;;  %1399 = vrot.lane.b32.xlu0 %v5126_v25, %s4648_s15 }
  0xcb   : > { %4169 = vmatprep.subr.mxu0 %v902_v26  ;;  %4342 = vmatprep.subr.mxu1 %v5102_v16 }
  0xcc   : > { %4170 = vmatpush3.msra.mxu0 %v902_v26  ;;  %v898_v30 = vpop.permute.xlu0 %897  ;;  %v896_v31 = vpop.permute.xlu1 %895  ;;  %4343 = vmatpush3.msra.mxu1 %v5102_v16 }
  0xcd   : > { %4171 = vmatprep.subr.mxu0 %v900_v27  ;;  %1397 = vrot.lane.b32.xlu1 %v5134_v28, %s4648_s15 }
  0xce   : > { %4172 = vmatpush3.msra.mxu0 %v900_v27  ;;  %1395 = vrot.lane.b32.xlu0 %v5137_v29, %s4648_s15 }
  0xcf   : > { %4173 = vmatprep.subr.mxu0 %v898_v30  ;;  %4344 = vmatprep.subr.mxu1 %v5110_v19 }
  0xd0   : > { %4174 = vmatpush3.msra.mxu0 %v898_v30  ;;  %v894_v32 = vpop.permute.xlu0 %893  ;;  %v892_v33 = vpop.permute.xlu1 %891  ;;  %4345 = vmatpush3.msra.mxu1 %v5110_v19 }
  0xd1   : > { %4175 = vmatprep.subr.mxu0 %v896_v31  ;;  %1393 = vrot.lane.b32.xlu1 %v4963_v36, %s4648_s15 }
  0xd2   : > { %4176 = vmatpush3.msra.mxu0 %v896_v31  ;;  %1391 = vrot.lane.b32.xlu0 %v4966_v37, %s4648_s15 }
  0xd3   : > { %4177 = vmatprep.subr.mxu0 %v894_v32  ;;  %4346 = vmatprep.subr.mxu1 %v5113_v20 }
  0xd4   : > { %4178 = vmatpush3.msra.mxu0 %v894_v32  ;;  %v890_v34 = vpop.permute.xlu0 %889  ;;  %v888_v35 = vpop.permute.xlu1 %887  ;;  %4347 = vmatpush3.msra.mxu1 %v5113_v20 }
  0xd5   : > { %4179 = vmatprep.subr.mxu0 %v892_v33  ;;  %1389 = vrot.lane.b32.xlu1 %v4976_v38, %s4648_s15 }
  0xd6   : > { %4180 = vmatpush3.msra.mxu0 %v892_v33  ;;  %1387 = vrot.lane.b32.xlu0 %v4979_v39, %s4648_s15 }
  0xd7   : > { %4181 = vmatprep.subr.mxu0 %v890_v34  ;;  %4348 = vmatprep.subr.mxu1 %v5122_v23 }
  0xd8   : > { %4182 = vmatpush3.msra.mxu0 %v890_v34  ;;  %v886_v44 = vpop.permute.xlu0 %885  ;;  %v884_v45 = vpop.permute.xlu1 %883  ;;  %4349 = vmatpush3.msra.mxu1 %v5122_v23 }
  0xd9   : > { %4183 = vmatprep.subr.mxu0 %v888_v35  ;;  %1385 = vrot.lane.b32.xlu1 %v4989_v40, %s4648_s15 }
  0xda   : > { %4184 = vmatpush3.msra.mxu0 %v888_v35  ;;  %1383 = vrot.lane.b32.xlu0 %v4992_v41, %s4648_s15 }
  0xdb   : > { %4185 = vmatprep.subr.mxu0 %v886_v44  ;;  %4350 = vmatprep.subr.mxu1 %v5126_v25 }
  0xdc   : > { %4186 = vmatpush3.msra.mxu0 %v886_v44  ;;  %v882_v46 = vpop.permute.xlu0 %881  ;;  %v880_v47 = vpop.permute.xlu1 %879  ;;  %4351 = vmatpush3.msra.mxu1 %v5126_v25 }
  0xdd   : > { %4187 = vmatprep.subr.mxu0 %v884_v45  ;;  %1381 = vrot.lane.b32.xlu1 %v5002_v42, %s4648_s15 }
  0xde   : > { %4188 = vmatpush3.msra.mxu0 %v884_v45  ;;  %1379 = vrot.lane.b32.xlu0 %v5005_v43, %s4648_s15 }
  0xdf   : > { %4189 = vmatprep.subr.mxu0 %v882_v46  ;;  %4352 = vmatprep.subr.mxu1 %v5134_v28 }
  0xe0   : > { %4190 = vmatpush3.msra.mxu0 %v882_v46  ;;  %v878_v48 = vpop.permute.xlu0 %877  ;;  %v876_v49 = vpop.permute.xlu1 %875  ;;  %4353 = vmatpush3.msra.mxu1 %v5134_v28 }
  0xe1   : > { %4191 = vmatprep.subr.mxu0 %v880_v47  ;;  %4354 = vmatprep.subr.mxu1 %v5137_v29 }
  0xe2   : > { %4192 = vmatpush3.msra.mxu0 %v880_v47  ;;  %4355 = vmatpush3.msra.mxu1 %v5137_v29 }
  0xe3   : > { %4193 = vmatprep.subr.mxu0 %v878_v48  ;;  %4356 = vmatprep.subr.mxu1 %v4963_v36 }
  0xe4   : > { %4194 = vmatpush3.msra.mxu0 %v878_v48  ;;  %v1158_v50 = vpop.permute.xlu0 %1157  ;;  %v1156_v51 = vpop.permute.xlu1 %1155  ;;  %4357 = vmatpush3.msra.mxu1 %v4963_v36 }
  0xe5   : > { %4195 = vmatprep.subr.mxu0 %v876_v49  ;;  %4358 = vmatprep.subr.mxu1 %v4966_v37 }
  0xe6   : > { %4196 = vmatpush3.msra.mxu0 %v876_v49  ;;  %4359 = vmatpush3.msra.mxu1 %v4966_v37 }
  0xe7   : > { %4198 = vmatmul.mubr.f32.vlgmr.msra.gmra.mxu0 %v5069_v63  ;;  %4235 = vmatprep.subr.mxu0 %v1158_v50 }
  0xe8   : > { %4236 = vmatpush3.msra.mxu0 %v1158_v50  ;;  %v1154_v52 = vpop.permute.xlu0 %1153  ;;  %v1152_v53 = vpop.permute.xlu1 %1151  ;;  %4267 = vmatprep.mubr.f32.mxu0 %v4790_v13 }
  0xe9   : > { %4237 = vmatprep.subr.mxu0 %v1156_v51  ;;  %4360 = vmatprep.subr.mxu1 %v4976_v38 }
  0xea   : > { %4238 = vmatpush3.msra.mxu0 %v1156_v51  ;;  %4361 = vmatpush3.msra.mxu1 %v4976_v38 }
  0xeb   : > { %4239 = vmatprep.subr.mxu0 %v1154_v52  ;;  %4362 = vmatprep.subr.mxu1 %v4979_v39 }
  0xec   : > { %4240 = vmatpush3.msra.mxu0 %v1154_v52  ;;  %v1150_v36 = vpop.permute.xlu0 %1149  ;;  %v1148_v37 = vpop.permute.xlu1 %1147  ;;  %4363 = vmatpush3.msra.mxu1 %v4979_v39 }
  0xed   : > { %4241 = vmatprep.subr.mxu0 %v1152_v53  ;;  %4364 = vmatprep.subr.mxu1 %v4989_v40 }
  0xee   : > { %4242 = vmatpush3.msra.mxu0 %v1152_v53  ;;  %4365 = vmatpush3.msra.mxu1 %v4989_v40 }
  0xef   : > { %4243 = vmatprep.subr.mxu0 %v1150_v36  ;;  %4366 = vmatprep.subr.mxu1 %v4992_v41 }
  0xf0   : > { %4244 = vmatpush3.msra.mxu0 %v1150_v36  ;;  %v1146_v38 = vpop.permute.xlu0 %1145  ;;  %v1144_v54 = vpop.permute.xlu1 %1143  ;;  %4367 = vmatpush3.msra.mxu1 %v4992_v41 }
  0xf1   : > { %4245 = vmatprep.subr.mxu0 %v1148_v37  ;;  %1661 = vrot.lane.b32.xlu1 %v1612_v55, %s4648_s15 }
  0xf2   : > { %4246 = vmatpush3.msra.mxu0 %v1148_v37  ;;  %4368 = vmatprep.subr.mxu1 %v5002_v42 }
  0xf3   : > { %4247 = vmatprep.subr.mxu0 %v1146_v38  ;;  %4369 = vmatpush3.msra.mxu1 %v5002_v42 }
  0xf4   : > { %4248 = vmatpush3.msra.mxu0 %v1146_v38  ;;  %v1142_v39 = vpop.permute.xlu0 %1141  ;;  %v1140_v40 = vpop.permute.xlu1 %1139  ;;  %4370 = vmatprep.subr.mxu1 %v5005_v43 }
  0xf5   : > { %4249 = vmatprep.subr.mxu0 %v1144_v54  ;;  %4371 = vmatpush3.msra.mxu1 %v5005_v43 }
  0xf6   : > { %4250 = vmatpush3.msra.mxu0 %v1144_v54  ;;  %4372 = vmatprep.mubr.f32.mxu1 %v4783_v12 }
  0xf7   : > { %4251 = vmatprep.subr.mxu0 %v1142_v39  ;;  %4373 = vmatmul.mubr.f32.vlgmr.msra.gmra.mxu1 %v4837_v24 }
  0xf8   : > { %4252 = vmatpush3.msra.mxu0 %v1142_v39  ;;  %v1138_v41 = vpop.permute.xlu0 %1137  ;;  %4410 = vmatprep.subr.mxu1 %v1612_v55 }
  0xf9   : > { %4253 = vmatprep.subr.mxu0 %v1140_v40  ;;  %v1136_v42 = vpop.permute.xlu1 %1135  ;;  %4411 = vmatpush3.msra.mxu1 %v1612_v55 }
  0xfa   : > { %4254 = vmatpush3.msra.mxu0 %v1140_v40  ;;  %1659 = vrot.lane.b32.xlu0 %v1611_v56, %s4648_s15 }
  0xfb   : > { %4255 = vmatprep.subr.mxu0 %v1138_v41  ;;  %4412 = vmatprep.subr.mxu1 %v1611_v56 }
  0xfc   : > { %4256 = vmatpush3.msra.mxu0 %v1138_v41  ;;  %v1134_v57 = vpop.permute.xlu0 %1133  ;;  %4413 = vmatpush3.msra.mxu1 %v1611_v56 }
  0xfd   : > { %4257 = vmatprep.subr.mxu0 %v1136_v42  ;;  %v1132_v12 = vpop.permute.xlu1 %1131  ;;  %4414 = vmatprep.subr.mxu1 %v1610_v58  ;;  %v4094_v30 = vpop.f32.mrf.mxu1 }
  0xfe   : > { %4258 = vmatpush3.msra.mxu0 %v1136_v42  ;;  %1657 = vrot.lane.b32.xlu0 %v1610_v58, %s4648_s15 }
  0xff   : > { %4259 = vmatprep.subr.mxu0 %v1134_v57  ;;  %4415 = vmatpush3.msra.mxu1 %v1610_v58  ;;  %v559_v33 = vpop.f32.mrf.mxu1 }
 0x100   : > { %4260 = vmatpush3.msra.mxu0 %v1134_v57  ;;  %v1130_v24 = vpop.permute.xlu0 %1129  ;;  %4416 = vmatprep.subr.mxu1 %v1609_v59 }
 0x101   : > { %4261 = vmatprep.subr.mxu0 %v1132_v12  ;;  %v1128_v43 = vpop.permute.xlu1 %1127  ;;  %4417 = vmatpush3.msra.mxu1 %v1609_v59 }
 0x102   : > { %4262 = vmatpush3.msra.mxu0 %v1132_v12  ;;  %1655 = vrot.lane.b32.xlu0 %v1609_v59, %s4648_s15 }
 0x103   : > { %4263 = vmatprep.subr.mxu0 %v1130_v24  ;;  %4418 = vmatprep.subr.mxu1 %v1608_v60 }
 0x104   : > { %4264 = vmatpush3.msra.mxu0 %v1130_v24  ;;  %4419 = vmatpush3.msra.mxu1 %v1608_v60 }
 0x105   : > { %4265 = vmatprep.subr.mxu0 %v1128_v43  ;;  %4420 = vmatprep.subr.mxu1 %v1607_v61 }
 0x106   : > { %4266 = vmatpush3.msra.mxu0 %v1128_v43  ;;  %1653 = vrot.lane.b32.xlu0 %v1608_v60, %s4648_s15 }
 0x107   : > { %4268 = vmatmul.mubr.f32.vlgmr.msra.gmra.mxu0 %v5069_v63  ;;  %4421 = vmatpush3.msra.mxu1 %v1607_v61 }
 0x108   : > { %4337 = vmatprep.mubr.f32.mxu0 %v4790_v13  ;;  %v1606_v13 = vld [vmem:[%s4718_s14 + $0x188] sm:$0xff] }
 0x109   : > { %4422 = vmatprep.subr.mxu1 %v1606_v13 }
 0x10a   : > { %1651 = vrot.lane.b32.xlu0 %v1607_v61, %s4648_s15  ;;  %4423 = vmatpush3.msra.mxu1 %v1606_v13 }
 0x10b   : > { %4424 = vmatprep.subr.mxu1 %v1605_v62 }
 0x10c   : > { %4425 = vmatpush3.msra.mxu1 %v1605_v62 }
 0x10d   : > { %4426 = vmatprep.subr.mxu1 %v5098_v15 }
 0x10e   : > { %1649 = vrot.lane.b32.xlu0 %v1606_v13, %s4648_s15  ;;  %v5210_v0 = vpop.permute.xlu1 %1329  ;;  %4427 = vmatpush3.msra.mxu1 %v5098_v15 }
 0x10f   : > { %v5213_v1 = vpop.permute.xlu0 %1334  ;;  %4428 = vmatprep.subr.mxu1 %v5102_v16 }
 0x110   : > { %4429 = vmatpush3.msra.mxu1 %v5102_v16 }
 0x111   : > { %4430 = vmatprep.subr.mxu1 %v5110_v19 }
 0x112   : > { %1647 = vrot.lane.b32.xlu0 %v1605_v62, %s4648_s15  ;;  %4431 = vmatpush3.msra.mxu1 %v5110_v19  ;;  %v5223_v2 = vpop.permute.xlu1 %1082 }
 0x113   : > { %4432 = vmatprep.subr.mxu1 %v5113_v20 }
 0x114   : > { %4433 = vmatpush3.msra.mxu1 %v5113_v20 }
 0x115   : > { %4434 = vmatprep.subr.mxu1 %v5122_v23 }
 0x116   : > { %1645 = vrot.lane.b32.xlu0 %v5098_v15, %s4648_s15  ;;  %v5226_v3 = vpop.permute.xlu0 %1077  ;;  %4435 = vmatpush3.msra.mxu1 %v5122_v23 }
 0x117   : > { %4436 = vmatprep.subr.mxu1 %v5126_v25 }
 0x118   : > { %4437 = vmatpush3.msra.mxu1 %v5126_v25 }
 0x119   : > { %v5235_v4 = vpop.permute.xlu1 %830  ;;  %4438 = vmatprep.subr.mxu1 %v5134_v28 }
 0x11a   : > { %1643 = vrot.lane.b32.xlu0 %v5102_v16, %s4648_s15  ;;  %4439 = vmatpush3.msra.mxu1 %v5134_v28 }
 0x11b   : > { %4440 = vmatprep.subr.mxu1 %v5137_v29 }
 0x11c   : > { %v5238_v5 = vpop.permute.xlu0 %825  ;;  %4441 = vmatpush3.msra.mxu1 %v5137_v29 }
 0x11e   : > { %1639 = vrot.lane.b32.xlu0 %v5113_v20, %s4648_s15 }
 0x11f   : > { %v578_v6 = vpop.permute.xlu1 %577 }
 0x122   : > { %1635 = vrot.lane.b32.xlu0 %v5126_v25, %s4648_s15 }
 0x124   : > { %v5247_v7 = vpop.permute.xlu0 %572 }
 0x126   : > { %1631 = vrot.lane.b32.xlu0 %v5137_v29, %s4648_s15 }
 0x128   : > { %v4164_v53 = vpop.f32.mrf.mxu1 }
 0x12a   : > { %v812_v38 = vpop.f32.mrf.mxu1 }
 0x133   : > { %v1410_v8 = vpop.permute.xlu1 %1409 }
 0x134   : > { %4305 = vmatprep.subr.mxu0 %v1410_v8  ;;  %v1408_v9 = vpop.permute.xlu0 %1407 }
 0x135   : > { %4306 = vmatpush3.msra.mxu0 %v1410_v8 }
 0x136   : > { %4307 = vmatprep.subr.mxu0 %v1408_v9 }
 0x137   : > { %4308 = vmatpush3.msra.mxu0 %v1408_v9  ;;  %v1406_v10 = vpop.permute.xlu1 %1405 }
 0x138   : > { %4309 = vmatprep.subr.mxu0 %v1406_v10  ;;  %v1404_v11 = vpop.permute.xlu0 %1403 }
 0x139   : > { %4310 = vmatpush3.msra.mxu0 %v1406_v10 }
 0x13a   : > { %4311 = vmatprep.subr.mxu0 %v1404_v11 }
 0x13b   : > { %4312 = vmatpush3.msra.mxu0 %v1404_v11  ;;  %v1402_v14 = vpop.permute.xlu1 %1401 }
 0x13c   : > { %4313 = vmatprep.subr.mxu0 %v1402_v14  ;;  %v1400_v15 = vpop.permute.xlu0 %1399 }
 0x13d   : > { %4314 = vmatpush3.msra.mxu0 %v1402_v14 }
 0x13e   : > { %4315 = vmatprep.subr.mxu0 %v1400_v15 }
 0x13f   : > { %4316 = vmatpush3.msra.mxu0 %v1400_v15  ;;  %v1398_v16 = vpop.permute.xlu1 %1397 }
 0x140   : > { %4317 = vmatprep.subr.mxu0 %v1398_v16  ;;  %v1396_v17 = vpop.permute.xlu0 %1395 }
 0x141   : > { %4318 = vmatpush3.msra.mxu0 %v1398_v16  ;;  %v1595_v16 = vld [vmem:[%s6102_s1] sm:$0xff] }
 0x142   : > { %4319 = vmatprep.subr.mxu0 %v1396_v17  ;;  %4442 = vmatprep.mubr.f32.mxu1 %v1595_v16  ;;  %v5485_v16 = vld [vmem:[%s6104_s3 + $0x50] sm:$0xff] }
 0x143   : > { %4320 = vmatpush3.msra.mxu0 %v1396_v17  ;;  %v1394_v18 = vpop.permute.xlu1 %1393  ;;  %6150 = vst [vmem:[#allocation5_spill] sm:$0xff] %v5485_v16 }
 0x144   : > { %4321 = vmatprep.subr.mxu0 %v1394_v18  ;;  %v1392_v20 = vpop.permute.xlu0 %1391 }
 0x145   : > { %4322 = vmatpush3.msra.mxu0 %v1394_v18 }
 0x146   : > { %4323 = vmatprep.subr.mxu0 %v1392_v20 }
 0x147   : > { %4324 = vmatpush3.msra.mxu0 %v1392_v20  ;;  %v1390_v21 = vpop.permute.xlu1 %1389  ;;  %v1596_v20 = vld [vmem:[%s6102_s1 + $0x8] sm:$0xff] }
 0x148   : > { %4325 = vmatprep.subr.mxu0 %v1390_v21  ;;  %v1388_v22 = vpop.permute.xlu0 %1387  ;;  %4443 = vmatmul.mubr.f32.vlgmr.msra.gmra.mxu1 %v1596_v20 }
 0x149   : > { %4326 = vmatpush3.msra.mxu0 %v1390_v21 }
 0x14a   : > { %4327 = vmatprep.subr.mxu0 %v1388_v22 }
 0x14b   : > { %4328 = vmatpush3.msra.mxu0 %v1388_v22  ;;  %v1386_v25 = vpop.permute.xlu1 %1385 }
 0x14c   : > { %4329 = vmatprep.subr.mxu0 %v1386_v25  ;;  %v1384_v26 = vpop.permute.xlu0 %1383 }
 0x14d   : > { %4330 = vmatpush3.msra.mxu0 %v1386_v25 }
 0x14e   : > { %4331 = vmatprep.subr.mxu0 %v1384_v26 }
 0x14f   : > { %4332 = vmatpush3.msra.mxu0 %v1384_v26  ;;  %v1382_v27 = vpop.permute.xlu1 %1381 }
 0x150   : > { %4333 = vmatprep.subr.mxu0 %v1382_v27  ;;  %v1380_v29 = vpop.permute.xlu0 %1379 }
 0x151   : > { %4334 = vmatpush3.msra.mxu0 %v1382_v27 }
 0x152   : > { %4335 = vmatprep.subr.mxu0 %v1380_v29 }
 0x153   : > { %4336 = vmatpush3.msra.mxu0 %v1380_v29 }
 0x154   : > { %4338 = vmatmul.mubr.f32.vlgmr.msra.gmra.mxu0 %v5069_v63 }
 0x158   : > { %v4234_v61 = vpop.f32.mrf.mxu1 }
 0x15a   : > { %v1064_v62 = vpop.f32.mrf.mxu1 }
 0x163   : > { %v1662_v31 = vpop.permute.xlu1 %1661 }
 0x164   : > { %4375 = vmatprep.subr.mxu0 %v1662_v31 }
 0x165   : > { %4376 = vmatpush3.msra.mxu0 %v1662_v31  ;;  %v5371_v31 = vld [vmem:[%s6105_s4] sm:$0xff] }
 0x167   : > { %v4059_v32 = vpop.f32.mrf.mxu0 }
 0x168   : > { %v565_v34 = vadd.f32 %v4094_v30, %v4059_v32  ;;  %v5377_v32 = vld [vmem:[%s6105_s4 + $0x10] sm:$0xff] }
 0x169   : > { %v484_v35 = vpop.f32.mrf.mxu0 }
 0x16a   : > { %v560_v44 = vadd.f32 %v559_v33, %v484_v35  ;;  %v581_v45 = vadd.f32 %v578_v6, %v565_v34  ;;  %v4639_v33 = vld [vmem:[%s6103_s2 + $0x8] sm:$0xff] }
 0x16c   : > { %v583_v46 = vmax.f32 %v581_v45, 0.0  ;;  %v580_v47 = vadd.f32 %v5247_v7, %v560_v44  ;;  %v1660_v49 = vpop.permute.xlu0 %1659 }
 0x16d   : > { %4377 = vmatprep.subr.mxu0 %v1660_v49 }
 0x16e   : > { %586 = vst.msk [vmem:[#allocation2 + $0x8] sm:$0xff] %vm584_vm0, %v583_v46  ;;  %v582_v48 = vmax.f32 %v580_v47, 0.0  ;;  %4378 = vmatpush3.msra.mxu0 %v1660_v49 }
 0x170   : > { %585 = vst.msk [vmem:[#allocation2] sm:$0xff] %vm584_vm0, %v582_v48  ;;  %v1658_v51 = vpop.permute.xlu0 %1657 }
 0x171   : > { %4379 = vmatprep.subr.mxu0 %v1658_v51 }
 0x172   : > { %4380 = vmatpush3.msra.mxu0 %v1658_v51 }
 0x174   : > { %v1656_v52 = vpop.permute.xlu0 %1655 }
 0x175   : > { %v5255_v63 = vld [vmem:[#allocation2 + $0x8] sm:$0xff]  ;;  %4381 = vmatprep.subr.mxu0 %v1656_v52 }
 0x176   : > { %1874 = vrot.lane.b32.xlu1 %v5255_v63, %s4648_s15  ;;  %4382 = vmatpush3.msra.mxu0 %v1656_v52 }
 0x177   : > { %v5259_v50 = vld [vmem:[#allocation2] sm:$0xff] }
 0x178   : > { %v1654_v36 = vpop.permute.xlu0 %1653 }
 0x179   : > { %4383 = vmatprep.subr.mxu0 %v1654_v36 }
 0x17a   : > { %1872 = vrot.lane.b32.xlu1 %v5259_v50, %s4648_s15  ;;  %4384 = vmatpush3.msra.mxu0 %v1654_v36 }
 0x17c   : > { %v1652_v55 = vpop.permute.xlu0 %1651 }
 0x17d   : > { %4385 = vmatprep.subr.mxu0 %v1652_v55 }
 0x17e   : > { %4386 = vmatpush3.msra.mxu0 %v1652_v55 }
 0x180   : > { %v1650_v57 = vpop.permute.xlu0 %1649 }
 0x181   : > { %4387 = vmatprep.subr.mxu0 %v1650_v57 }
 0x182   : > { %4388 = vmatpush3.msra.mxu0 %v1650_v57  ;;  %v3551_v57 = vld [vmem:[%s6102_s1 + $0x18] sm:$0xff] }
 0x184   : > { %v1648_v24 = vpop.permute.xlu0 %1647 }
 0x185   : > { %4389 = vmatprep.subr.mxu0 %v1648_v24 }
 0x186   : > { %4390 = vmatpush3.msra.mxu0 %v1648_v24 }
 0x187   : > { %v4129_v37 = vpop.f32.mrf.mxu0 }
 0x188   : > { %v818_v54 = vadd.f32 %v4164_v53, %v4129_v37  ;;  %v1646_v43 = vpop.permute.xlu0 %1645 }
 0x189   : > { %v737_v39 = vpop.f32.mrf.mxu0  ;;  %4391 = vmatprep.subr.mxu0 %v1646_v43 }
 0x18a   : > { %v834_v40 = vadd.f32 %v5235_v4, %v818_v54  ;;  %v813_v41 = vadd.f32 %v812_v38, %v737_v39  ;;  %4392 = vmatpush3.msra.mxu0 %v1646_v43 }
 0x18c   : > { %v836_v42 = vmax.f32 %v834_v40, 0.0  ;;  %v833_v56 = vadd.f32 %v5238_v5, %v813_v41  ;;  %v1644_v59 = vpop.permute.xlu0 %1643 }
 0x18d   : > { %4393 = vmatprep.subr.mxu0 %v1644_v59 }
 0x18e   : > { %838 = vst.msk [vmem:[#allocation2 + $0x18] sm:$0xff] %vm584_vm0, %v836_v42  ;;  %v835_v12 = vmax.f32 %v833_v56, 0.0  ;;  %4394 = vmatpush3.msra.mxu0 %v1644_v59  ;;  %v5394_v56 = vld [vmem:[%s6104_s3 + $0x28] sm:$0xff] }
 0x190   : > { %837 = vst.msk [vmem:[#allocation2 + $0x10] sm:$0xff] %vm584_vm0, %v835_v12  ;;  %v1640_v34 = vpop.permute.xlu0 %1639 }
 0x194   : > { %v1636_v44 = vpop.permute.xlu0 %1635 }
 0x195   : > { %v5267_v58 = vld [vmem:[#allocation2 + $0x18] sm:$0xff] }
 0x196   : > { %1878 = vrot.lane.b32.xlu1 %v5267_v58, %s4648_s15 }
 0x197   : > { %v5271_v60 = vld [vmem:[#allocation2 + $0x10] sm:$0xff] }
 0x198   : > { %v1632_v47 = vpop.permute.xlu0 %1631 }
 0x19a   : > { %1876 = vrot.lane.b32.xlu1 %v5271_v60, %s4648_s15 }
 0x1a7   : > { %v4199_v13 = vpop.f32.mrf.mxu0 }
 0x1a8   : > { %v1070_v4 = vadd.f32 %v4234_v61, %v4199_v13  ;;  %v5416_v13 = vld [vmem:[%s6104_s3 + $0x30] sm:$0xff] }
 0x1a9   : > { %v989_v5 = vpop.f32.mrf.mxu0 }
 0x1aa   : > { %v1086_v6 = vadd.f32 %v5223_v2, %v1070_v4  ;;  %v1065_v7 = vadd.f32 %v1064_v62, %v989_v5  ;;  %v4304_v2 = vpop.f32.mrf.mxu1  ;;  %v5423_v62 = vld [vmem:[%s6104_s3 + $0x38] sm:$0xff]  ;;  %v5440_v5 = vld [vmem:[%s6104_s3] sm:$0xff] }
 0x1ac   : > { %v1088_v8 = vmax.f32 %v1086_v6, 0.0  ;;  %v1085_v9 = vadd.f32 %v5226_v3, %v1065_v7  ;;  %v1316_v17 = vpop.f32.mrf.mxu1  ;;  %v5451_v7 = vld [vmem:[%s6104_s3 + $0x8] sm:$0xff] }
 0x1ae   : > { %1090 = vst.msk [vmem:[#allocation2 + $0x28] sm:$0xff] %vm584_vm0, %v1088_v8  ;;  %v1087_v10 = vmax.f32 %v1085_v9, 0.0 }
 0x1b0   : > { %1089 = vst.msk [vmem:[#allocation2 + $0x20] sm:$0xff] %vm584_vm0, %v1087_v10  ;;  %v5471_v10 = vld [vmem:[%s6104_s3 + $0x48] sm:$0xff] }
 0x1b1   : > { %6149 = vst [vmem:[#allocation4_spill] sm:$0xff] %v5471_v10 }
 0x1b5   : > { %v5279_v11 = vld [vmem:[#allocation2 + $0x28] sm:$0xff] }
 0x1b6   : > { %2106 = vrot.lane.b32.xlu0 %v5279_v11, %s4650_s28  ;;  %1882 = vrot.lane.b32.xlu1 %v5279_v11, %s4648_s15 }
 0x1b7   : > { %v5285_v14 = vld [vmem:[#allocation2 + $0x20] sm:$0xff] }
 0x1ba   : > { %2104 = vrot.lane.b32.xlu0 %v5285_v14, %s4650_s28  ;;  %1880 = vrot.lane.b32.xlu1 %v5285_v14, %s4648_s15 }
 0x1be   : > { %2102 = vrot.lane.b32.xlu0 %v5267_v58, %s4650_s28 }
 0x1c7   : > { %v4269_v3 = vpop.f32.mrf.mxu0 }
 0x1c8   : > { %v1322_v15 = vadd.f32 %v4304_v2, %v4269_v3  ;;  %v5476_v3 = vld [vmem:[%s6104_s3 + $0x10] sm:$0xff] }
 0x1c9   : > { %v1241_v18 = vpop.f32.mrf.mxu0 }
 0x1ca   : > { %v1338_v21 = vadd.f32 %v5213_v1, %v1322_v15  ;;  %v1317_v22 = vadd.f32 %v1316_v17, %v1241_v18  ;;  %v3550_v1 = vld [vmem:[%s6102_s1 + $0x10] sm:$0xff]  ;;  %v5492_v17 = vld [vmem:[%s6104_s3 + $0x18] sm:$0xff] }
 0x1cb   : > { %4407 = vmatprep.mubr.f32.mxu0 %v3550_v1 }
 0x1cc   : > { %v1340_v25 = vmax.f32 %v1338_v21, 0.0  ;;  %v1337_v26 = vadd.f32 %v5210_v0, %v1317_v22  ;;  %v5316_v0 = vld [vmem:[%s6104_s3 + $0x20] sm:$0xff]  ;;  %v5499_v21 = vld [vmem:[%s6104_s3 + $0x58] sm:$0xff] }
 0x1cd   : > { %4461 = vmatprep.mubr.msk.f32.mxu1 %vm1896_vm1, %v5316_v0  ;;  %6151 = vst [vmem:[#allocation6_spill] sm:$0xff] %v5499_v21  ;;  %v5506_v22 = vld [vmem:[%s6104_s3 + $0x60] sm:$0xff] }
 0x1ce   : > { %1342 = vst.msk [vmem:[#allocation2 + $0x38] sm:$0xff] %vm584_vm0, %v1340_v25  ;;  %v1339_v27 = vmax.f32 %v1337_v26, 0.0 }
 0x1d0   : > { %1341 = vst.msk [vmem:[#allocation2 + $0x30] sm:$0xff] %vm584_vm0, %v1339_v27 }
 0x1d5   : > { %v5303_v29 = vld [vmem:[#allocation2 + $0x38] sm:$0xff] }
 0x1d6   : > { %1886 = vrot.lane.b32.xlu1 %v5303_v29, %s4648_s15 }
 0x1d7   : > { %v5307_v30 = vld [vmem:[#allocation2 + $0x30] sm:$0xff] }
 0x1d8   : > { %2108 = vrot.lane.b32.xlu0 %v5307_v30, %s4650_s28 }
 0x1da   : > { %1884 = vrot.lane.b32.xlu1 %v5307_v30, %s4648_s15 }
 0x1dc   : > { %2100 = vrot.lane.b32.xlu0 %v5271_v60, %s4650_s28 }
 0x1de   : > { %1641 = vrot.lane.b32.xlu1 %v5110_v19, %s4648_s15  ;;  %v5340_v19 = vld [vmem:[%s6105_s4 + $0x8] sm:$0xff] }
 0x1e0   : > { %2098 = vrot.lane.b32.xlu0 %v5255_v63, %s4650_s28 }
 0x1e2   : > { %1637 = vrot.lane.b32.xlu1 %v5122_v23, %s4648_s15  ;;  %v5348_v23 = vld [vmem:[%s6105_s4 + $0x18] sm:$0xff] }
 0x1e4   : > { %2096 = vrot.lane.b32.xlu0 %v5259_v50, %s4650_s28 }
 0x1e6   : > { %1633 = vrot.lane.b32.xlu1 %v5134_v28, %s4648_s15  ;;  %v4638_v28 = vld [vmem:[%s6103_s2] sm:$0xff] }
 0x1e8   : > { %2226 = vrot.lane.b32.xlu0 %v5259_v50, %s4651_s19  ;;  %v1875_v35 = vpop.permute.xlu1 %1874 }
 0x1ea   : > { %2110 = vrot.lane.b32.xlu1 %v5303_v29, %s4650_s28 }
 0x1ec   : > { %2362 = vperm.xlu0 %4636, %v5340_v19   ;;  %v1873_v45 = vpop.permute.xlu1 %1872 }
 0x1ee   : > { %2240 = vrot.lane.b32.xlu1 %v5303_v29, %s4651_s19 }
 0x1f0   : > { %2372 = vperm.xlu0 %4636, %v5348_v23  }
 0x1f2   : > { %2236 = vrot.lane.b32.xlu1 %v5279_v11, %s4651_s19 }
 0x1f4   : > { %1833 = vperm.xlu0 %4636, %v4638_v28  }
 0x1f6   : > { %2234 = vrot.lane.b32.xlu1 %v5285_v14, %s4651_s19 }
 0x1f8   : > { %1581 = vperm.xlu0 %4636, %v4638_v28  }
 0x1fa   : > { %2238 = vrot.lane.b32.xlu1 %v5307_v30, %s4651_s19 }
 0x1fe   : > { %2232 = vrot.lane.b32.xlu1 %v5267_v58, %s4651_s19 }
 0x202   : > { %2230 = vrot.lane.b32.xlu1 %v5271_v60, %s4651_s19 }
 0x206   : > { %2228 = vrot.lane.b32.xlu1 %v5255_v63, %s4651_s19 }
 0x208   : > { %v1879_v46 = vpop.permute.xlu1 %1878 }
 0x20a   : > { %2357 = vperm.xlu1 %4637, %v5371_v31  }
 0x20c   : > { %v1877_v48 = vpop.permute.xlu1 %1876 }
 0x20e   : > { %2367 = vperm.xlu1 %4637, %v5377_v32  }
 0x212   : > { %1838 = vperm.xlu1 %4637, %v4639_v33  }
 0x214   : > { %v5442_v6 = vpop.f32.mrf.mxu0 }
 0x216   : > { %1586 = vperm.xlu1 %4637, %v4639_v33   ;;  %v5518_v33 = vld [vmem:[%s6104_s3 + $0x68] sm:$0xff] }
 0x228   : > { %v2107_v49 = vpop.permute.xlu0 %2106  ;;  %v1883_v51 = vpop.permute.xlu1 %1882 }
 0x22c   : > { %v5383_v52 = vpop.permute.xlu0 %2104  ;;  %v1881_v53 = vpop.permute.xlu1 %1880 }
 0x230   : > { %v5385_v36 = vpop.permute.xlu0 %2102 }
 0x248   : > { %v1887_v37 = vpop.permute.xlu1 %1886 }
 0x249   : > { %4445 = vmatprep.subr.mxu1 %v1887_v37 }
 0x24a   : > { %4446 = vmatpush3.msra.mxu1 %v1887_v37  ;;  %v2109_v38 = vpop.permute.xlu0 %2108  ;;  %v5562_v37 = vld [vmem:[%s6106_s5 + $0x60] sm:$0xff] }
 0x24b   : > { %6153 = vst [vmem:[#allocation8_spill] sm:$0xff] %v5562_v37 }
 0x24c   : > { %v1885_v54 = vpop.permute.xlu1 %1884 }
 0x24d   : > { %4447 = vmatprep.subr.mxu1 %v1885_v54 }
 0x24e   : > { %4448 = vmatpush3.msra.mxu1 %v1885_v54  ;;  %v5387_v39 = vpop.permute.xlu0 %2100  ;;  %v5574_v54 = vld [vmem:[%s6106_s5 + $0x50] sm:$0xff] }
 0x24f   : > { %4449 = vmatprep.subr.mxu1 %v1883_v51  ;;  %6155 = vst [vmem:[#allocation10_spill] sm:$0xff] %v5574_v54 }
 0x250   : > { %4450 = vmatpush3.msra.mxu1 %v1883_v51  ;;  %v1642_v55 = vpop.permute.xlu1 %1641 }
 0x251   : > { %4395 = vmatprep.subr.mxu0 %v1642_v55  ;;  %4451 = vmatprep.subr.mxu1 %v1881_v53 }
 0x252   : > { %4396 = vmatpush3.msra.mxu0 %v1642_v55  ;;  %4452 = vmatpush3.msra.mxu1 %v1881_v53  ;;  %v5389_v41 = vpop.permute.xlu0 %2098  ;;  %v2397_v53 = vld [vmem:[%s6106_s5 + $0x70] sm:$0x7f]  ;;  %v5580_v55 = vld [vmem:[%s6106_s5 + $0x48] sm:$0xff] }
 0x253   : > { %4397 = vmatprep.subr.mxu0 %v1640_v34  ;;  %4453 = vmatprep.subr.mxu1 %v1879_v46  ;;  %6156 = vst [vmem:[#allocation11_spill] sm:$0xff] %v5580_v55 }
 0x254   : > { %4398 = vmatpush3.msra.mxu0 %v1640_v34  ;;  %4454 = vmatpush3.msra.mxu1 %v1879_v46  ;;  %v1638_v40 = vpop.permute.xlu1 %1637  ;;  %v5524_v34 = vld [vmem:[%s6104_s3 + $0x70] sm:$0xff] }
 0x255   : > { %4399 = vmatprep.subr.mxu0 %v1638_v40  ;;  %4455 = vmatprep.subr.mxu1 %v1877_v48 }
 0x256   : > { %4400 = vmatpush3.msra.mxu0 %v1638_v40  ;;  %4456 = vmatpush3.msra.mxu1 %v1877_v48  ;;  %v2097_v24 = vpop.permute.xlu0 %2096  ;;  %v5594_v40 = vld [vmem:[%s6106_s5 + $0x38] sm:$0xff] }
 0x257   : > { %4401 = vmatprep.subr.mxu0 %v1636_v44  ;;  %4457 = vmatprep.subr.mxu1 %v1875_v35  ;;  %6158 = vst [vmem:[#allocation13_spill] sm:$0xff] %v5594_v40 }
 0x258   : > { %4402 = vmatpush3.msra.mxu0 %v1636_v44  ;;  %4458 = vmatpush3.msra.mxu1 %v1875_v35  ;;  %v1634_v42 = vpop.permute.xlu1 %1633  ;;  %v5534_v35 = vld [vmem:[%s6104_s3 + $0x78] sm:$0xff] }
 0x259   : > { %4403 = vmatprep.subr.mxu0 %v1634_v42  ;;  %4459 = vmatprep.subr.mxu1 %v1873_v45 }
 0x25a   : > { %4404 = vmatpush3.msra.mxu0 %v1634_v42  ;;  %4460 = vmatpush3.msra.mxu1 %v1873_v45  ;;  %v5408_v59 = vpop.permute.xlu0 %2226  ;;  %v5606_v42 = vld [vmem:[%s6106_s5 + $0x28] sm:$0xff] }
 0x25b   : > { %4405 = vmatprep.subr.mxu0 %v1632_v47  ;;  %4467 = vmatprep.subr.mxu1 %v5303_v29  ;;  %6160 = vst [vmem:[#allocation15_spill] sm:$0xff] %v5606_v42 }
 0x25c   : > { %4406 = vmatpush3.msra.mxu0 %v1632_v47  ;;  %4462 = vmatmul.mubr.msk.f32.vlgmr.msra.gmra.mxu1 %vm1896_vm1, %v5394_v56  ;;  %v2111_v12 = vpop.permute.xlu1 %2110 }
 0x25d   : > { %4468 = vmatpush3.msra.mxu1 %v5303_v29  ;;  %4408 = vmatmul.mubr.f32.vlgmr.msra.gmra.mxu0 %v3551_v57  ;;  %v5612_v57 = vld [vmem:[%s6106_s5 + $0x20] sm:$0xff] }
 0x25e   : > { %4469 = vmatprep.subr.mxu1 %v5307_v30  ;;  %4489 = vmatprep.subr.mxu0 %v2111_v12  ;;  %6161 = vst [vmem:[#allocation16_spill] sm:$0xff] %v5612_v57 }
 0x25f   : > { %4470 = vmatpush3.msra.mxu1 %v5307_v30  ;;  %4490 = vmatpush3.msra.mxu0 %v2111_v12  ;;  %v5618_v12 = vld [vmem:[%s6106_s5 + $0x18] sm:$0xff] }
 0x260   : > { %4471 = vmatprep.subr.mxu1 %v5279_v11  ;;  %4491 = vmatprep.subr.mxu0 %v2109_v38  ;;  %v2241_v43 = vpop.permute.xlu1 %2240  ;;  %6162 = vst [vmem:[#allocation17_spill] sm:$0xff] %v5618_v12 }
 0x261   : > { %4472 = vmatpush3.msra.mxu1 %v5279_v11  ;;  %4492 = vmatpush3.msra.mxu0 %v2109_v38  ;;  %v5568_v38 = vld [vmem:[%s6106_s5 + $0x58] sm:$0xff] }
 0x262   : > { %4473 = vmatprep.subr.mxu1 %v5285_v14  ;;  %4493 = vmatprep.subr.mxu0 %v2107_v49  ;;  %6154 = vst [vmem:[#allocation9_spill] sm:$0xff] %v5568_v38 }
 0x263   : > { %4474 = vmatpush3.msra.mxu1 %v5285_v14  ;;  %4494 = vmatpush3.msra.mxu0 %v2107_v49 }
 0x264   : > { %4475 = vmatprep.subr.mxu1 %v5267_v58  ;;  %4495 = vmatprep.subr.mxu0 %v5383_v52  ;;  %v2237_v61 = vpop.permute.xlu1 %2236 }
 0x265   : > { %4476 = vmatpush3.msra.mxu1 %v5267_v58  ;;  %4496 = vmatpush3.msra.mxu0 %v5383_v52  ;;  %v2398_v52 = vld [vmem:[%s6106_s5 + $0x78] sm:$0x7f] }
 0x266   : > { %4477 = vmatprep.subr.mxu1 %v5271_v60  ;;  %4497 = vmatprep.subr.mxu0 %v5385_v36 }
 0x267   : > { %4464 = vmatprep.mubr.msk.f32.mxu1 %vm1896_vm1, %v5416_v13  ;;  %4478 = vmatpush3.msra.mxu1 %v5271_v60  ;;  %v5430_v4 = vpop.permute.xlu0 %2362  ;;  %v5444_v60 = vpop.f32.mrf.mxu1 }
 0x268   : > { %4498 = vmatpush3.msra.mxu0 %v5385_v36  ;;  %4465 = vmatmul.mubr.msk.f32.gmra.mxu1 %vm1896_vm1, %v5423_v62  ;;  %v2235_v58 = vpop.permute.xlu1 %2234  ;;  %v1574_v47 = vadd.f32 %v5444_v60, %v5442_v6  ;;  %v5556_v36 = vld [vmem:[%s6106_s5 + $0x68] sm:$0xff]  ;;  %v5648_v6 = vld [vmem:[%s6108_s7 + $0x78] sm:$0xff]  ;;  %v5653_v60 = vld [vmem:[%s6108_s7 + $0xf0] sm:$0xff] }
 0x269   : > { %4479 = vmatprep.subr.mxu1 %v5255_v63  ;;  %4499 = vmatprep.subr.mxu0 %v5387_v39  ;;  %v1568_v2 = vpop.f32.mrf.mxu1  ;;  %6152 = vst [vmem:[#allocation7_spill] sm:$0xff] %v5556_v36 }
 0x26a   : > { %4480 = vmatpush3.msra.mxu1 %v5255_v63  ;;  %4500 = vmatpush3.msra.mxu0 %v5387_v39  ;;  %v5463_v63 = vld [vmem:[%s6104_s3 + $0x40] sm:$0xff] }
 0x26b   : > { %4481 = vmatprep.subr.mxu1 %v5259_v50  ;;  %4501 = vmatprep.subr.mxu0 %v5389_v41  ;;  %v5455_v8 = vpop.permute.xlu0 %2372  ;;  %6148 = vst [vmem:[#allocation3_spill] sm:$0xff] %v5463_v63  ;;  %v5588_v39 = vld [vmem:[%s6106_s5 + $0x40] sm:$0xff] }
 0x26c   : > { %4482 = vmatpush3.msra.mxu1 %v5259_v50  ;;  %4483 = vmatprep.mubr.msk.f32.mxu1 %vm1896_vm1, %v5440_v5  ;;  %v2239_v9 = vpop.permute.xlu1 %2238  ;;  %v1493_v50 = vpop.f32.mrf.mxu0  ;;  %6157 = vst [vmem:[#allocation12_spill] sm:$0xff] %v5588_v39 }
 0x26d   : > { %4502 = vmatpush3.msra.mxu0 %v5389_v41  ;;  %4484 = vmatmul.mubr.msk.f32.vlgmr.msra.gmra.mxu1 %vm1896_vm1, %v5451_v7  ;;  %v1569_v20 = vadd.f32 %v1568_v2, %v1493_v50  ;;  %v5600_v41 = vld [vmem:[%s6106_s5 + $0x30] sm:$0xff]  ;;  %v5665_v50 = vld [vmem:[%s6108_s7 + $0xe8] sm:$0xff] }
 0x26e   : > { %4503 = vmatprep.subr.mxu0 %v2097_v24  ;;  %4511 = vmatprep.subr.mxu1 %v2241_v43  ;;  %6159 = vst [vmem:[#allocation14_spill] sm:$0xff] %v5600_v41  ;;  %v5671_v2 = vld [vmem:[%s6108_s7 + $0x68] sm:$0xff] }
 0x26f   : > { %4504 = vmatpush3.msra.mxu0 %v2097_v24  ;;  %4505 = vmatprep.mubr.msk.f32.mxu0 %vm1896_vm1, %v5463_v63  ;;  %v5480_v15 = vpop.permute.xlu0 %1833  ;;  %v5624_v24 = vld [vmem:[%s6106_s5 + $0x10] sm:$0xff] }
 0x270   : > { %4512 = vmatpush3.msra.mxu1 %v2241_v43  ;;  %4506 = vmatmul.mubr.msk.f32.vlgmr.msra.gmra.mxu0 %vm1896_vm1, %v5471_v10  ;;  %v2233_v18 = vpop.permute.xlu1 %2232  ;;  %6163 = vst [vmem:[#allocation18_spill] sm:$0xff] %v5624_v24  ;;  %v5630_v43 = vld [vmem:[%s6106_s5 + $0x8] sm:$0xff] }
 0x271   : > { %4513 = vmatprep.subr.mxu1 %v2239_v9  ;;  %4486 = vmatprep.mubr.msk.f32.mxu1 %vm1896_vm1, %v5476_v3  ;;  %6164 = vst [vmem:[#allocation19_spill] sm:$0xff] %v5630_v43 }
 0x272   : > { %4514 = vmatpush3.msra.mxu1 %v2239_v9  ;;  %4508 = vmatprep.mubr.msk.f32.mxu0 %vm1896_vm1, %v5485_v16  ;;  %v5659_v9 = vld [vmem:[%s6108_s7 + $0x70] sm:$0xff]  ;;  %v5838_v16 = vld [vmem:[%s6108_s7] sm:$0xff] }
 0x273   : > { %4487 = vmatmul.mubr.msk.f32.gmra.mxu1 %vm1896_vm1, %v5492_v17  ;;  %4515 = vmatprep.subr.mxu1 %v2237_v61  ;;  %v1582_v25 = vpop.permute.xlu0 %1581  ;;  %6182 = vst [vmem:[#allocation37_spill] sm:$0xff] %v5838_v16 }
 0x274   : > { %4516 = vmatpush3.msra.mxu1 %v2237_v61  ;;  %4509 = vmatmul.mubr.msk.f32.gmra.mxu0 %vm1896_vm1, %v5499_v21  ;;  %v1589_v26 = vadd.f32 %v1582_v25, %v1569_v20  ;;  %v2231_v27 = vpop.permute.xlu1 %2230  ;;  %v6111_v61 = vmov 0.0   ;;  %v5683_v20 = vld [vmem:[%s6108_s7 + $0x60] sm:$0xff]  ;;  %v5689_v25 = vld [vmem:[%s6108_s7 + $0xd8] sm:$0xff] }
 0x275   : > { %4517 = vmatprep.subr.mxu1 %v2235_v58  ;;  %4527 = vmatprep.mubr.msk.f32.mxu1 %vm1896_vm1, %v5506_v22 }
 0x276   : > { %4518 = vmatpush3.msra.mxu1 %v2235_v58  ;;  %v1591_v1 = vmax.f32 %v1589_v26, 0.0  ;;  %3580 = vmatprep.subr.msk.mxu0 %vm2424_vm2, %v2398_v52  ;;  %v5643_v58 = vld [vmem:[%s6108_s7 + $0xf8] sm:$0xff] }
 0x277   : > { %4519 = vmatprep.subr.mxu1 %v2233_v18  ;;  %3581 = vmatpush1.msk.msra.mxu0 %vm2424_vm2, %v2397_v53  ;;  %v5695_v26 = vld [vmem:[%s6108_s7 + $0x58] sm:$0xff] }
 0x278   : > { %1593 = vst.msk [vmem:[#allocation2 + $0x40] sm:$0xff] %vm584_vm0, %v1591_v1  ;;  %4520 = vmatpush3.msra.mxu1 %v2233_v18  ;;  %v2229_v28 = vpop.permute.xlu1 %2228  ;;  %2449 = vmatprep.subr.mxu0 %v5556_v36  ;;  %v5677_v18 = vld [vmem:[%s6108_s7 + $0xe0] sm:$0xff]  ;;  %v5707_v1 = vld [vmem:[%s6108_s7 + $0x50] sm:$0xff] }
 0x279   : > { %4521 = vmatprep.subr.mxu1 %v2231_v27  ;;  %2450 = vmatpush1.msra.mxu0 %v5562_v37  ;;  %v5830_v37 = vld [vmem:[%s6108_s7 + $0x80] sm:$0xff] }
 0x27a   : > { %4522 = vmatpush3.msra.mxu1 %v2231_v27  ;;  %2451 = vmatprep.subr.mxu0 %v5568_v38  ;;  %v5701_v27 = vld [vmem:[%s6108_s7 + $0xd0] sm:$0xff]  ;;  %v5825_v38 = vld [vmem:[%s6108_s7 + $0x8] sm:$0xff]  ;;  %6181 = vst [vmem:[#allocation36_spill] sm:$0xff] %v5830_v37 }
 0x27b   : > { %4523 = vmatprep.subr.mxu1 %v2229_v28  ;;  %2452 = vmatpush1.msra.mxu0 %v5574_v54  ;;  %6180 = vst [vmem:[#allocation35_spill] sm:$0xff] %v5825_v38 }
 0x27c   : > { %4524 = vmatpush3.msra.mxu1 %v2229_v28  ;;  %2453 = vmatprep.subr.mxu0 %v5580_v55  ;;  %v5713_v28 = vld [vmem:[%s6108_s7 + $0xc8] sm:$0xff] }
 0x27d   : > { %4525 = vmatprep.subr.mxu1 %v5408_v59  ;;  %2454 = vmatpush1.msra.mxu0 %v5588_v39  ;;  %v5808_v39 = vld [vmem:[%s6108_s7 + $0x10] sm:$0xff]  ;;  %v5814_v55 = vld [vmem:[%s6108_s7 + $0x88] sm:$0xff] }
 0x27e   : > { %4526 = vmatpush3.msra.mxu1 %v5408_v59  ;;  %2455 = vmatprep.subr.mxu0 %v5594_v40  ;;  %v5636_v59 = vld [vmem:[%s6106_s5] sm:$0xff]  ;;  %6178 = vst [vmem:[#allocation33_spill] sm:$0xff] %v5808_v39  ;;  %6179 = vst [vmem:[#allocation34_spill] sm:$0xff] %v5814_v55 }
 0x27f   : > { %4528 = vmatmul.mubr.msk.f32.vlgmr.msra.gmra.mxu1 %vm1896_vm1, %v5518_v33  ;;  %2456 = vmatpush1.msra.mxu0 %v5600_v41  ;;  %6165 = vst [vmem:[#allocation20_spill] sm:$0xff] %v5636_v59  ;;  %v5797_v41 = vld [vmem:[%s6108_s7 + $0x18] sm:$0xff] }
 0x280   : > { %4530 = vmatprep.mubr.msk.f32.mxu1 %vm1896_vm1, %v5524_v34  ;;  %2457 = vmatprep.subr.mxu0 %v5606_v42  ;;  %6176 = vst [vmem:[#allocation31_spill] sm:$0xff] %v5797_v41 }
 0x281   : > { %2458 = vmatpush1.msra.mxu0 %v5612_v57  ;;  %2495 = vmatprep.mubr.f32.mxu0 %v6111_v61  ;;  %v5739_v61 = vld [vmem:[%s6108_s7 + $0xb8] sm:$0xff] }
 0x282   : > { %2459 = vmatprep.subr.mxu0 %v5618_v12  ;;  %3889 = vmatprep.subr.mxu1 %v5643_v58  ;;  %6167 = vst [vmem:[#allocation22_spill] sm:$0xff] %v5739_v61  ;;  %v5746_v57 = vld [vmem:[%s6108_s7 + $0x38] sm:$0xff] }
 0x283   : > { %4531 = vmatmul.mubr.msk.f32.gmra.mxu1 %vm1896_vm1, %v5534_v35  ;;  %2460 = vmatpush1.msra.mxu0 %v5624_v24  ;;  %6168 = vst [vmem:[#allocation23_spill] sm:$0xff] %v5746_v57 }
 0x284   : > { %2461 = vmatprep.subr.mxu0 %v5630_v43  ;;  %3890 = vmatpush3.msra.mxu1 %v5648_v6 }
 0x285   : > { %v5538_v44 = vpop.permute.xlu1 %2357  ;;  %2462 = vmatpush1.msra.mxu0 %v5636_v59  ;;  %3891 = vmatprep.subr.mxu1 %v5653_v60 }
 0x286   : > { %3892 = vmatpush3.msra.mxu1 %v5659_v9 }
 0x287   : > { %3893 = vmatprep.subr.mxu1 %v5665_v50 }
 0x288   : > { %3894 = vmatpush3.msra.mxu1 %v5671_v2 }
 0x289   : > { %v5540_v45 = vpop.permute.xlu1 %2367  ;;  %3895 = vmatprep.subr.mxu1 %v5677_v18 }
 0x28a   : > { %3896 = vmatpush3.msra.mxu1 %v5683_v20 }
 0x28b   : > { %3897 = vmatprep.subr.mxu1 %v5689_v25 }
 0x28c   : > { %3898 = vmatpush3.msra.mxu1 %v5695_v26 }
 0x28d   : > { %v5542_v46 = vpop.permute.xlu1 %1838  ;;  %3899 = vmatprep.subr.mxu1 %v5701_v27 }
 0x28e   : > { %3900 = vmatpush3.msra.mxu1 %v5707_v1 }
 0x28f   : > { %3901 = vmatprep.subr.mxu1 %v5713_v28 }
 0x291   : > { %v1587_v48 = vpop.permute.xlu1 %1586 }
 0x292   : > { %v1590_v49 = vadd.f32 %v1587_v48, %v1574_v47  ;;  %v5719_v47 = vld [vmem:[%s6108_s7 + $0x48] sm:$0xff]  ;;  %v5725_v48 = vld [vmem:[%s6108_s7 + $0xc0] sm:$0xff] }
 0x293   : > { %3902 = vmatpush3.msra.mxu1 %v5719_v47 }
 0x294   : > { %v1592_v51 = vmax.f32 %v1590_v49, 0.0  ;;  %v5731_v49 = vld [vmem:[%s6108_s7 + $0x40] sm:$0xff]  ;;  %3903 = vmatprep.subr.mxu1 %v5725_v48 }
 0x295   : > { %6166 = vst [vmem:[#allocation21_spill] sm:$0xff] %v5731_v49  ;;  %3904 = vmatpush3.msra.mxu1 %v5731_v49 }
 0x296   : > { %1594 = vst.msk [vmem:[#allocation2 + $0x48] sm:$0xff] %vm584_vm0, %v1592_v51  ;;  %v4444_v51 = vpop.f32.mrf.mxu1  ;;  %3905 = vmatprep.subr.mxu1 %v5739_v61 }
 0x297   : > { %3906 = vmatpush3.msra.mxu1 %v5746_v57 }
 0x298   : > { %v1820_v59 = vpop.f32.mrf.mxu1 }
 0x29d   : > { %v5843_v10 = vld [vmem:[#allocation2 + $0x48] sm:$0xff] }
 0x31d   : > { %v4409_v52 = vpop.f32.mrf.mxu0 }
 0x31e   : > { %v1826_v53 = vadd.f32 %v4444_v51, %v4409_v52  ;;  %v5751_v51 = vld [vmem:[%s6108_s7 + $0xb0] sm:$0xff] }
 0x31f   : > { %v1745_v43 = vpop.f32.mrf.mxu0  ;;  %6169 = vst [vmem:[#allocation24_spill] sm:$0xff] %v5751_v51  ;;  %v5757_v52 = vld [vmem:[%s6108_s7 + $0x30] sm:$0xff]  ;;  %3907 = vmatprep.subr.mxu1 %v5751_v51 }
 0x320   : > { %v1842_v24 = vadd.f32 %v5542_v46, %v1826_v53  ;;  %v1821_v12 = vadd.f32 %v1820_v59, %v1745_v43  ;;  %6170 = vst [vmem:[#allocation25_spill] sm:$0xff] %v5757_v52  ;;  %v5764_v43 = vld [vmem:[%s6108_s7 + $0xa8] sm:$0xff]  ;;  %v4463_v59 = vpop.f32.mrf.mxu1  ;;  %3908 = vmatpush3.msra.mxu1 %v5757_v52 }
 0x321   : > { %6171 = vst [vmem:[#allocation26_spill] sm:$0xff] %v5764_v43  ;;  %3909 = vmatprep.subr.mxu1 %v5764_v43 }
 0x322   : > { %v1844_v42 = vmax.f32 %v1842_v24, 0.0  ;;  %v1841_v46 = vadd.f32 %v5480_v15, %v1821_v12  ;;  %v5772_v24 = vld [vmem:[%s6108_s7 + $0x28] sm:$0xff]  ;;  %v5777_v15 = vld [vmem:[%s6108_s7 + $0xa0] sm:$0xff] }
 0x323   : > { %6172 = vst [vmem:[#allocation27_spill] sm:$0xff] %v5772_v24  ;;  %6173 = vst [vmem:[#allocation28_spill] sm:$0xff] %v5777_v15  ;;  %3910 = vmatpush3.msra.mxu1 %v5772_v24  ;;  %v5783_v12 = vld [vmem:[%s6108_s7 + $0x20] sm:$0xff] }
 0x324   : > { %1846 = vst.msk [vmem:[#allocation2 + $0x58] sm:$0xff] %vm584_vm0, %v1844_v42  ;;  %v1843_v53 = vmax.f32 %v1841_v46, 0.0  ;;  %6174 = vst [vmem:[#allocation29_spill] sm:$0xff] %v5783_v12  ;;  %3911 = vmatprep.subr.mxu1 %v5777_v15  ;;  %v5790_v42 = vld [vmem:[%s6108_s7 + $0x98] sm:$0xff]  ;;  %v1975_v46 = vpop.f32.mrf.mxu1 }
 0x325   : > { %6175 = vst [vmem:[#allocation30_spill] sm:$0xff] %v5790_v42  ;;  %3912 = vmatpush3.msra.mxu1 %v5783_v12 }
 0x326   : > { %1845 = vst.msk [vmem:[#allocation2 + $0x50] sm:$0xff] %vm584_vm0, %v1843_v53  ;;  %3913 = vmatprep.subr.mxu1 %v5790_v42  ;;  %v5802_v53 = vld [vmem:[%s6108_s7 + $0x90] sm:$0xff] }
 0x327   : > { %6177 = vst [vmem:[#allocation32_spill] sm:$0xff] %v5802_v53  ;;  %3914 = vmatpush3.msra.mxu1 %v5797_v41 }
 0x328   : > { %v4466_v40 = vpop.f32.mrf.mxu1  ;;  %3915 = vmatprep.subr.mxu1 %v5802_v53 }
 0x329   : > { %3916 = vmatpush3.msra.mxu1 %v5808_v39 }
 0x32a   : > { %3917 = vmatprep.subr.mxu1 %v5814_v55  ;;  %v1985_v36 = vpop.f32.mrf.mxu1  ;;  %v5848_v55 = vld [vmem:[#allocation2 + $0x40] sm:$0xff] }
 0x32b   : > { %v5816_v54 = vld [vmem:[#allocation2 + $0x58] sm:$0xff]  ;;  %3918 = vmatpush3.msra.mxu1 %v5825_v38 }
 0x32c   : > { %2695 = vrot.lane.b32.xlu1 %v5816_v54, %s4648_s15  ;;  %3919 = vmatprep.subr.mxu1 %v5830_v37 }
 0x32d   : > { %v5832_v21 = vld [vmem:[#allocation2 + $0x50] sm:$0xff]  ;;  %3920 = vmatpush3.msra.mxu1 %v5838_v16  ;;  %v4485_v63 = vpop.f32.mrf.mxu1 }
 0x32e   : > { %2693 = vrot.lane.b32.xlu0 %v5832_v21, %s4648_s15  ;;  %v2078_v53 = vadd.f32 %v4485_v63, %v4463_v59 }
 0x32f   : > { %v2072_v38 = vpop.f32.mrf.mxu1 }
 0x330   : > { %2691 = vrot.lane.b32.xlu1 %v5843_v10, %s4648_s15  ;;  %v4507_v39 = vpop.f32.mrf.mxu0  ;;  %v2073_v41 = vadd.f32 %v2072_v38, %v1975_v46 }
 0x331   : > { %v2218_v24 = vadd.f32 %v4507_v39, %v2078_v53 }
 0x332   : > { %2689 = vrot.lane.b32.xlu0 %v5848_v55, %s4648_s15  ;;  %v2198_v37 = vpop.f32.mrf.mxu0 }
 0x333   : > { %v4488_v16 = vpop.f32.mrf.mxu1  ;;  %v2217_v43 = vadd.f32 %v2198_v37, %v2073_v41 }
 0x334   : > { %2687 = vrot.lane.b32.xlu1 %v5303_v29, %s4648_s15  ;;  %v4510_v12 = vpop.f32.mrf.mxu0  ;;  %v2088_v59 = vadd.f32 %v4488_v16, %v4466_v40  ;;  %v6183_v16 = vmov 0.0  }
 0x335   : > { %v2082_v42 = vpop.f32.mrf.mxu1 }
 0x336   : > { %2685 = vrot.lane.b32.xlu0 %v5307_v30, %s4648_s15  ;;  %v2083_v52 = vadd.f32 %v2082_v42, %v1985_v36  ;;  %v2208_v51 = vpop.f32.mrf.mxu0 }
 0x338   : > { %2683 = vrot.lane.b32.xlu1 %v5279_v11, %s4648_s15  ;;  %v2219_v46 = vadd.f32 %v2208_v51, %v2083_v52 }
 0x33a   : > { %2681 = vrot.lane.b32.xlu0 %v5285_v14, %s4648_s15 }
 0x33c   : > { %2917 = vrot.lane.b32.xlu1 %v5816_v54, %s4650_s28 }
 0x33e   : > { %2913 = vrot.lane.b32.xlu0 %v5843_v10, %s4650_s28 }
 0x33f   : > { %v4529_v15 = vpop.f32.mrf.mxu1 }
 0x340   : > { %3046 = vrot.lane.b32.xlu1 %v5816_v54, %s4651_s19  ;;  %v2348_v61 = vadd.f32 %v4529_v15, %v2218_v24 }
 0x341   : > { %v2328_v57 = vpop.f32.mrf.mxu1 }
 0x342   : > { %v2347_v63 = vadd.f32 %v2328_v57, %v2217_v43  ;;  %2911 = vrot.lane.b32.xlu0 %v5848_v55, %s4650_s28  ;;  %v2376_v36 = vadd.f32 %v5430_v4, %v2348_v61  ;;  %v2220_v57 = vadd.f32 %v4510_v12, %v2088_v59 }
 0x343   : > { %v4532_v38 = vpop.f32.mrf.mxu1 }
 0x344   : > { %v2375_v49 = vadd.f32 %v5538_v44, %v2347_v63  ;;  %3042 = vrot.lane.b32.xlu1 %v5843_v10, %s4651_s19  ;;  %v2380_v44 = vmax.f32 %v2376_v36, 0.0  ;;  %v2350_v40 = vadd.f32 %v4532_v38, %v2220_v57 }
 0x345   : > { %v2338_v37 = vpop.f32.mrf.mxu1 }
 0x346   : > { %v2379_v39 = vmax.f32 %v2375_v49, 0.0  ;;  %v2349_v41 = vadd.f32 %v2338_v37, %v2219_v46  ;;  %2909 = vrot.lane.b32.xlu0 %v5303_v29, %s4650_s28  ;;  %v2378_v4 = vadd.f32 %v5455_v8, %v2350_v40 }
 0x348   : > { %3582 = vmatmul.mubr.msk.f32.vlgmr.msra.gmra.mxu0 %vm2411_vm3, %v2379_v39  ;;  %3040 = vrot.lane.b32.xlu1 %v5848_v55, %s4651_s19  ;;  %v2377_v51 = vadd.f32 %v5540_v45, %v2349_v41  ;;  %v2382_v45 = vmax.f32 %v2378_v4, 0.0 }
 0x349   : > { %2501 = vmatprep.mubr.f32.mxu0 %v6183_v16 }
 0x34a   : > { %2915 = vrot.lane.b32.xlu0 %v5832_v21, %s4650_s28  ;;  %v2381_v61 = vmax.f32 %v2377_v51, 0.0 }
 0x34c   : > { %3583 = vmatmul.mubr.msk.f32.gmra.mxu0 %vm2411_vm3, %v2380_v44  ;;  %3044 = vrot.lane.b32.xlu1 %v5832_v21, %s4651_s19 }
 0x34d   : > { %2507 = vmatprep.mubr.f32.mxu0 %v6183_v16 }
 0x34e   : > { %2907 = vrot.lane.b32.xlu0 %v5307_v30, %s4650_s28 }
 0x350   : > { %3584 = vmatmul.mubr.msk.f32.gmra.mxu0 %vm2411_vm3, %v2381_v61  ;;  %3038 = vrot.lane.b32.xlu1 %v5303_v29, %s4651_s19 }
 0x351   : > { %2513 = vmatprep.mubr.f32.mxu0 %v6183_v16 }
 0x352   : > { %2905 = vrot.lane.b32.xlu0 %v5279_v11, %s4650_s28 }
 0x354   : > { %3585 = vmatmul.mubr.msk.f32.gmra.mxu0 %vm2411_vm3, %v2382_v45  ;;  %3036 = vrot.lane.b32.xlu1 %v5307_v30, %s4651_s19 }
 0x355   : > { %4549 = vmatprep.mubr.msk.f32.mxu0 %vm1896_vm1, %v5316_v0 }
 0x356   : > { %2903 = vrot.lane.b32.xlu0 %v5285_v14, %s4650_s28 }
 0x358   : > { %3034 = vrot.lane.b32.xlu1 %v5279_v11, %s4651_s19 }
 0x35a   : > { %3032 = vrot.lane.b32.xlu0 %v5285_v14, %s4651_s19 }
 0x35c   : > { %3163 = vperm.xlu1 %4637, %v5371_v31  }
 0x35e   : > { %3168 = vperm.xlu0 %4636, %v5340_v19  }
 0x360   : > { %3173 = vperm.xlu1 %4637, %v5377_v32  }
 0x362   : > { %3178 = vperm.xlu0 %4636, %v5348_v23  }
 0x39e   : > { %v2696_v8 = vpop.permute.xlu1 %2695 }
 0x39f   : > { %4533 = vmatprep.subr.mxu0 %v2696_v8 }
 0x3a0   : > { %v2694_v0 = vpop.permute.xlu0 %2693  ;;  %4534 = vmatpush3.msra.mxu0 %v2696_v8 }
 0x3a1   : > { %4535 = vmatprep.subr.mxu0 %v2694_v0 }
 0x3a2   : > { %4536 = vmatpush3.msra.mxu0 %v2694_v0  ;;  %v2692_v49 = vpop.permute.xlu1 %2691 }
 0x3a3   : > { %4537 = vmatprep.subr.mxu0 %v2692_v49 }
 0x3a4   : > { %v2690_v52 = vpop.permute.xlu0 %2689  ;;  %4538 = vmatpush3.msra.mxu0 %v2692_v49 }
 0x3a5   : > { %4539 = vmatprep.subr.mxu0 %v2690_v52 }
 0x3a6   : > { %4540 = vmatpush3.msra.mxu0 %v2690_v52  ;;  %v2688_v43 = vpop.permute.xlu1 %2687 }
 0x3a7   : > { %4541 = vmatprep.subr.mxu0 %v2688_v43 }
 0x3a8   : > { %v2686_v31 = vpop.permute.xlu0 %2685  ;;  %4542 = vmatpush3.msra.mxu0 %v2688_v43 }
 0x3a9   : > { %4543 = vmatprep.subr.mxu0 %v2686_v31 }
 0x3aa   : > { %4544 = vmatpush3.msra.mxu0 %v2686_v31  ;;  %v2684_v19 = vpop.permute.xlu1 %2683 }
 0x3ab   : > { %4545 = vmatprep.subr.mxu0 %v2684_v19 }
 0x3ac   : > { %v2682_v23 = vpop.permute.xlu0 %2681  ;;  %4546 = vmatpush3.msra.mxu0 %v2684_v19 }
 0x3ad   : > { %4547 = vmatprep.subr.mxu0 %v2682_v23 }
 0x3ae   : > { %4548 = vmatpush3.msra.mxu0 %v2682_v23  ;;  %v5909_v32 = vpop.permute.xlu1 %2917 }
 0x3af   : > { %4555 = vmatprep.subr.mxu0 %v5816_v54  ;;  %4577 = vmatprep.subr.mxu1 %v5909_v32 }
 0x3b0   : > { %v5913_v24 = vpop.permute.xlu0 %2913  ;;  %4550 = vmatmul.mubr.msk.f32.vlgmr.msra.gmra.mxu0 %vm1896_vm1, %v5394_v56 }
 0x3b1   : > { %4556 = vmatpush3.msra.mxu0 %v5816_v54  ;;  %4552 = vmatprep.mubr.msk.f32.mxu0 %vm1896_vm1, %v5416_v13  ;;  %v6189_v54 = vld [vmem:[#allocation26_spill] sm:$0xff] }
 0x3b2   : > { %4557 = vmatprep.subr.mxu0 %v5832_v21  ;;  %v3047_v15 = vpop.permute.xlu1 %3046 }
 0x3b3   : > { %4558 = vmatpush3.msra.mxu0 %v5832_v21 }
 0x3b4   : > { %4559 = vmatprep.subr.mxu0 %v5843_v10  ;;  %v5923_v12 = vpop.permute.xlu0 %2911  ;;  %4553 = vmatmul.mubr.msk.f32.gmra.mxu0 %vm1896_vm1, %v5423_v62 }
 0x3b5   : > { %4560 = vmatpush3.msra.mxu0 %v5843_v10  ;;  %4571 = vmatprep.mubr.msk.f32.mxu0 %vm1896_vm1, %v5440_v5 }
 0x3b6   : > { %4561 = vmatprep.subr.mxu0 %v5848_v55  ;;  %v3043_v56 = vpop.permute.xlu1 %3042 }
 0x3b7   : > { %4562 = vmatpush3.msra.mxu0 %v5848_v55  ;;  %v6190_v55 = vld [vmem:[#allocation27_spill] sm:$0xff] }
 0x3b8   : > { %4563 = vmatprep.subr.mxu0 %v5303_v29  ;;  %v5933_v13 = vpop.permute.xlu0 %2909 }
 0x3b9   : > { %4564 = vmatpush3.msra.mxu0 %v5303_v29 }
 0x3ba   : > { %4565 = vmatprep.subr.mxu0 %v5307_v30  ;;  %v3041_v21 = vpop.permute.xlu1 %3040 }
 0x3bb   : > { %4566 = vmatpush3.msra.mxu0 %v5307_v30 }
 0x3bc   : > { %4567 = vmatprep.subr.mxu0 %v5279_v11  ;;  %v5939_v62 = vpop.permute.xlu0 %2915 }
 0x3bd   : > { %4568 = vmatpush3.msra.mxu0 %v5279_v11 }
 0x3be   : > { %4569 = vmatprep.subr.mxu0 %v5285_v14  ;;  %v3045_v5 = vpop.permute.xlu1 %3044 }
 0x3bf   : > { %4570 = vmatpush3.msra.mxu0 %v5285_v14 }
 0x3c0   : > { %4599 = vmatprep.subr.mxu0 %v3047_v15  ;;  %v5944_v10 = vpop.permute.xlu0 %2907  ;;  %4572 = vmatmul.mubr.msk.f32.vlgmr.msra.gmra.mxu0 %vm1896_vm1, %v5451_v7 }
 0x3c1   : > { %4600 = vmatpush3.msra.mxu0 %v3047_v15  ;;  %4574 = vmatprep.mubr.msk.f32.mxu0 %vm1896_vm1, %v5476_v3  ;;  %v6202_v15 = vld [vmem:[#allocation4_spill] sm:$0xff] }
 0x3c2   : > { %4601 = vmatprep.subr.mxu0 %v3045_v5  ;;  %v3039_v29 = vpop.permute.xlu1 %3038 }
 0x3c3   : > { %4602 = vmatpush3.msra.mxu0 %v3045_v5  ;;  %v6206_v5 = vld [vmem:[#allocation8_spill] sm:$0xff] }
 0x3c4   : > { %4603 = vmatprep.subr.mxu0 %v3043_v56  ;;  %v5950_v11 = vpop.permute.xlu0 %2905  ;;  %4575 = vmatmul.mubr.msk.f32.gmra.mxu0 %vm1896_vm1, %v5492_v17  ;;  %v6184_v17 = vld [vmem:[#allocation21_spill] sm:$0xff] }
 0x3c5   : > { %4604 = vmatpush3.msra.mxu0 %v3043_v56  ;;  %4615 = vmatprep.mubr.msk.f32.mxu0 %vm1896_vm1, %v5506_v22  ;;  %v6185_v22 = vld [vmem:[#allocation22_spill] sm:$0xff] }
 0x3c6   : > { %4605 = vmatprep.subr.mxu0 %v3041_v21  ;;  %v3037_v14 = vpop.permute.xlu1 %3036  ;;  %v6204_v56 = vld [vmem:[#allocation6_spill] sm:$0xff] }
 0x3c7   : > { %4606 = vmatpush3.msra.mxu0 %v3041_v21  ;;  %v3203_v21 = vld [vmem:[%s6106_s5 + $0x70] sm:$0x7f] }
 0x3c8   : > { %4607 = vmatprep.subr.mxu0 %v3039_v29  ;;  %v5956_v30 = vpop.permute.xlu0 %2903 }
 0x3c9   : > { %4608 = vmatpush3.msra.mxu0 %v3039_v29  ;;  %v6208_v29 = vld [vmem:[#allocation10_spill] sm:$0xff] }
 0x3ca   : > { %4609 = vmatprep.subr.mxu0 %v3037_v14  ;;  %v3035_v7 = vpop.permute.xlu1 %3034 }
 0x3cb   : > { %4610 = vmatpush3.msra.mxu0 %v3037_v14  ;;  %v6210_v14 = vld [vmem:[#allocation12_spill] sm:$0xff] }
 0x3cc   : > { %4611 = vmatprep.subr.mxu0 %v3035_v7  ;;  %v3033_v3 = vpop.permute.xlu0 %3032 }
 0x3cd   : > { %4612 = vmatpush3.msra.mxu0 %v3035_v7  ;;  %v6212_v7 = vld [vmem:[#allocation14_spill] sm:$0xff] }
 0x3ce   : > { %4613 = vmatprep.subr.mxu0 %v3033_v3 }
 0x3cf   : > { %4614 = vmatpush3.msra.mxu0 %v3033_v3  ;;  %v6213_v3 = vld [vmem:[#allocation15_spill] sm:$0xff] }
 0x3d0   : > { %4616 = vmatmul.mubr.msk.f32.vlgmr.msra.gmra.mxu0 %vm1896_vm1, %v5518_v33  ;;  %3981 = vmatprep.subr.mxu0 %v5643_v58  ;;  %v6186_v33 = vld [vmem:[#allocation23_spill] sm:$0xff]  ;;  %v6191_v58 = vld [vmem:[#allocation28_spill] sm:$0xff] }
 0x3d1   : > { %4618 = vmatprep.mubr.msk.f32.mxu0 %vm1896_vm1, %v5524_v34  ;;  %3982 = vmatpush3.msra.mxu0 %v5648_v6  ;;  %v6187_v34 = vld [vmem:[#allocation24_spill] sm:$0xff]  ;;  %v6192_v6 = vld [vmem:[#allocation29_spill] sm:$0xff] }
 0x3d2   : > { %3983 = vmatprep.subr.mxu0 %v5653_v60  ;;  %v6193_v60 = vld [vmem:[#allocation30_spill] sm:$0xff] }
 0x3d3   : > { %3984 = vmatpush3.msra.mxu0 %v5659_v9  ;;  %v6194_v9 = vld [vmem:[#allocation31_spill] sm:$0xff] }
 0x3d4   : > { %4619 = vmatmul.mubr.msk.f32.gmra.mxu0 %vm1896_vm1, %v5534_v35  ;;  %3985 = vmatprep.subr.mxu0 %v5665_v50  ;;  %v6188_v35 = vld [vmem:[#allocation25_spill] sm:$0xff]  ;;  %v6195_v50 = vld [vmem:[#allocation32_spill] sm:$0xff] }
 0x3d5   : > { %3986 = vmatpush3.msra.mxu0 %v5671_v2  ;;  %v6196_v2 = vld [vmem:[#allocation33_spill] sm:$0xff] }
 0x3d6   : > { %3987 = vmatprep.subr.mxu0 %v5677_v18  ;;  %v6197_v18 = vld [vmem:[#allocation34_spill] sm:$0xff] }
 0x3d7   : > { %3988 = vmatpush3.msra.mxu0 %v5683_v20  ;;  %v6198_v20 = vld [vmem:[#allocation35_spill] sm:$0xff] }
 0x3d8   : > { %3989 = vmatprep.subr.mxu0 %v5689_v25  ;;  %v6199_v25 = vld [vmem:[#allocation36_spill] sm:$0xff] }
 0x3d9   : > { %3990 = vmatpush3.msra.mxu0 %v5695_v26  ;;  %v6200_v26 = vld [vmem:[#allocation37_spill] sm:$0xff] }
 0x3da   : > { %3991 = vmatprep.subr.mxu0 %v5701_v27  ;;  %v2401_v27 = vlaneseq }
 0x3db   : > { %3992 = vmatpush3.msra.mxu0 %v5707_v1 }
 0x3dc   : > { %3993 = vmatprep.subr.mxu0 %v5713_v28  ;;  %v5996_v1 = vshrl.u32 %v2401_v27, 7 }
 0x3dd   : > { %3994 = vmatpush3.msra.mxu0 %v5719_v47  ;;  %v2399_v47 = vld [vmem:[%s6107_s6] sm:$0x3] }
 0x3de   : > { %3995 = vmatprep.subr.mxu0 %v5725_v48  ;;  %v2403_v28 = vsub.s32 0, %v5996_v1  ;;  %v2407_v48 = vsub.s32 1, %v5996_v1 }
 0x3df   : > { %3996 = vmatpush3.msra.mxu0 %v6184_v17  ;;  %v6214_v17 = vld [vmem:[#allocation16_spill] sm:$0xff] }
 0x3e0   : > { %3997 = vmatprep.subr.mxu0 %v6185_v22  ;;  %v2404_v42 = vrot.slane %v2399_v47, %v2403_v28  ;;  %v2408_v53 = vrot.slane %v2399_v47, %v2407_v48  ;;  %v6215_v22 = vld [vmem:[#allocation17_spill] sm:$0xff] }
 0x3e1   : > { %3998 = vmatpush3.msra.mxu0 %v6186_v33  ;;  %v6216_v33 = vld [vmem:[#allocation18_spill] sm:$0xff] }
 0x3e2   : > { %3999 = vmatprep.subr.mxu0 %v6187_v34  ;;  %v6217_v34 = vld [vmem:[#allocation19_spill] sm:$0xff] }
 0x3e3   : > { %4000 = vmatpush3.msra.mxu0 %v6188_v35  ;;  %v6218_v35 = vld [vmem:[#allocation20_spill] sm:$0xff] }
 0x3e4   : > { %4001 = vmatprep.subr.mxu0 %v6189_v54 }
 0x3e5   : > { %4002 = vmatpush3.msra.mxu0 %v6190_v55 }
 0x3e6   : > { %4003 = vmatprep.subr.mxu0 %v6191_v58 }
 0x3e7   : > { %4004 = vmatpush3.msra.mxu0 %v6192_v6 }
 0x3e8   : > { %4005 = vmatprep.subr.mxu0 %v6193_v60 }
 0x3e9   : > { %4006 = vmatpush3.msra.mxu0 %v6194_v9 }
 0x3ea   : > { %4007 = vmatprep.subr.mxu0 %v6195_v50  ;;  %v6057_v50 = vld [vmem:[%s6109_s8] ss:$0 sm:$0xff] }
 0x3eb   : > { %4008 = vmatpush3.msra.mxu0 %v6196_v2 }
 0x3ec   : > { %4009 = vmatprep.subr.mxu0 %v6197_v18 }
 0x3ed   : > { %4010 = vmatpush3.msra.mxu0 %v6198_v20 }
 0x3ee   : > { %4011 = vmatprep.subr.mxu0 %v6199_v25 }
 0x3ef   : > { %4012 = vmatpush3.msra.mxu0 %v6200_v26 }
 0x408   : > { %v2497_v63 = vpop.f32.mrf.mxu0 }
 0x409   : > { %v2498_v38 = vadd.f32 %v2497_v63, %v2404_v42 }
 0x40a   : > { %v2499_v59 = vpop.f32.mrf.mxu0 }
 0x40b   : > { %v2500_v46 = vadd.f32 %v2499_v59, %v2408_v53  ;;  %v2520_v39 = vmax.f32 %v2498_v38, 0.0 }
 0x40c   : > { %v2503_v37 = vpop.f32.mrf.mxu0 }
 0x40d   : > { %v2521_v36 = vmax.f32 %v2500_v46, 0.0  ;;  %v2504_v41 = vadd.f32 %v2503_v37, %v2404_v42 }
 0x40e   : > { %v2505_v57 = vpop.f32.mrf.mxu0 }
 0x40f   : > { %v2506_v44 = vadd.f32 %v2505_v57, %v2408_v53  ;;  %2631 = vmatprep.mubr.f32.mxu1 %v2521_v36  ;;  %v2522_v4 = vmax.f32 %v2504_v41, 0.0 }
 0x410   : > { %v2509_v40 = vpop.f32.mrf.mxu0  ;;  %2632 = vmatmul.mubr.f32.vlgmr.msra.gmra.mxu1 %v2520_v39 }
 0x411   : > { %v2523_v51 = vmax.f32 %v2506_v44, 0.0  ;;  %4578 = vmatpush3.msra.mxu1 %v5909_v32  ;;  %v2510_v61 = vadd.f32 %v2509_v40, %v2404_v42 }
 0x412   : > { %4579 = vmatprep.subr.mxu1 %v5939_v62  ;;  %v2511_v45 = vpop.f32.mrf.mxu0 }
 0x413   : > { %v2512_v8 = vadd.f32 %v2511_v45, %v2408_v53  ;;  %4580 = vmatpush3.msra.mxu1 %v5939_v62  ;;  %2636 = vmatprep.mubr.f32.mxu1 %v2523_v51  ;;  %v2524_v52 = vmax.f32 %v2510_v61, 0.0  ;;  %v6205_v62 = vld [vmem:[#allocation7_spill] sm:$0xff] }
 0x414   : > { %4581 = vmatprep.subr.mxu1 %v5913_v24  ;;  %v2515_v0 = vpop.f32.mrf.mxu0  ;;  %2637 = vmatmul.mubr.f32.gmra.mxu1 %v2522_v4 }
 0x415   : > { %v2525_v49 = vmax.f32 %v2512_v8, 0.0  ;;  %4582 = vmatpush3.msra.mxu1 %v5913_v24  ;;  %v2516_v43 = vadd.f32 %v2515_v0, %v2404_v42  ;;  %v6201_v24 = vld [vmem:[#allocation3_spill] sm:$0xff] }
 0x416   : > { %4583 = vmatprep.subr.mxu1 %v5923_v12  ;;  %v2517_v31 = vpop.f32.mrf.mxu0 }
 0x417   : > { %v2518_v19 = vadd.f32 %v2517_v31, %v2408_v53  ;;  %4584 = vmatpush3.msra.mxu1 %v5923_v12  ;;  %2641 = vmatprep.mubr.f32.mxu1 %v2525_v49  ;;  %v2526_v32 = vmax.f32 %v2516_v43, 0.0  ;;  %v6203_v12 = vld [vmem:[#allocation5_spill] sm:$0xff]  ;;  %v3164_v43 = vpop.permute.xlu1 %3163 }
 0x418   : > { %4585 = vmatprep.subr.mxu1 %v5933_v13  ;;  %2642 = vmatmul.mubr.f32.gmra.mxu1 %v2524_v52 }
 0x419   : > { %v2527_v23 = vmax.f32 %v2518_v19, 0.0  ;;  %4586 = vmatpush3.msra.mxu1 %v5933_v13  ;;  %v3204_v13 = vld [vmem:[%s6106_s5 + $0x78] sm:$0x7f] }
 0x41a   : > { %4587 = vmatprep.subr.mxu1 %v5944_v10 }
 0x41b   : > { %4588 = vmatpush3.msra.mxu1 %v5944_v10  ;;  %2646 = vmatprep.mubr.f32.mxu1 %v2527_v23  ;;  %v6207_v10 = vld [vmem:[#allocation9_spill] sm:$0xff] }
 0x41c   : > { %4589 = vmatprep.subr.mxu1 %v5950_v11  ;;  %2647 = vmatmul.mubr.f32.gmra.mxu1 %v2526_v32 }
 0x41d   : > { %4590 = vmatpush3.msra.mxu1 %v5950_v11  ;;  %4593 = vmatprep.mubr.msk.f32.mxu1 %vm1896_vm1, %v6201_v24  ;;  %v6209_v11 = vld [vmem:[#allocation11_spill] sm:$0xff] }
 0x41e   : > { %4591 = vmatprep.subr.mxu1 %v5956_v30 }
 0x41f   : > { %4592 = vmatpush3.msra.mxu1 %v5956_v30  ;;  %v6211_v30 = vld [vmem:[#allocation13_spill] sm:$0xff] }
 0x420   : > { %4594 = vmatmul.mubr.msk.f32.vlgmr.msra.gmra.mxu1 %vm1896_vm1, %v6202_v15  ;;  %3615 = vmatprep.subr.msk.mxu1 %vm2424_vm2, %v3204_v13  ;;  %v3169_v13 = vpop.permute.xlu0 %3168 }
 0x421   : > { %4596 = vmatprep.mubr.msk.f32.mxu1 %vm1896_vm1, %v6203_v12  ;;  %3616 = vmatpush1.msk.msra.mxu1 %vm2424_vm2, %v3203_v21 }
 0x422   : > { %3253 = vmatprep.subr.mxu1 %v6205_v62 }
 0x423   : > { %3254 = vmatpush1.msra.mxu1 %v6206_v5 }
 0x424   : > { %4597 = vmatmul.mubr.msk.f32.gmra.mxu1 %vm1896_vm1, %v6204_v56  ;;  %3255 = vmatprep.subr.mxu1 %v6207_v10 }
 0x425   : > { %3299 = vmatprep.mubr.f32.mxu1 %v6183_v16  ;;  %3256 = vmatpush1.msra.mxu1 %v6208_v29  ;;  %v3174_v29 = vpop.permute.xlu1 %3173 }
 0x426   : > { %3257 = vmatprep.subr.mxu1 %v6209_v11 }
 0x427   : > { %3258 = vmatpush1.msra.mxu1 %v6210_v14 }
 0x428   : > { %3259 = vmatprep.subr.mxu1 %v6211_v30 }
 0x429   : > { %3260 = vmatpush1.msra.mxu1 %v6212_v7  ;;  %v3179_v7 = vpop.permute.xlu0 %3178 }
 0x42a   : > { %3261 = vmatprep.subr.mxu1 %v6213_v3 }
 0x42b   : > { %3262 = vmatpush1.msra.mxu1 %v6214_v17 }
 0x42c   : > { %3263 = vmatprep.subr.mxu1 %v6215_v22 }
 0x42d   : > { %3264 = vmatpush1.msra.mxu1 %v6216_v33  ;;  %v3205_v33 = vld [vmem:[%s6107_s6] sm:$0x3] }
 0x42e   : > { %3265 = vmatprep.subr.mxu1 %v6217_v34  ;;  %v3210_v34 = vrot.slane %v3205_v33, %v2403_v28 }
 0x42f   : > { %3266 = vmatpush1.msra.mxu1 %v6218_v35  ;;  %v3214_v35 = vrot.slane %v3205_v33, %v2407_v48 }
 0x470   : > { %v4551_v54 = vpop.f32.mrf.mxu0 }
 0x472   : > { %v2783_v55 = vpop.f32.mrf.mxu0 }
 0x474   : > { %v4554_v58 = vpop.f32.mrf.mxu0 }
 0x476   : > { %v2793_v6 = vpop.f32.mrf.mxu0 }
 0x480   : > { %v4573_v60 = vpop.f32.mrf.mxu0 }
 0x481   : > { %v2886_v57 = vadd.f32 %v4573_v60, %v4551_v54 }
 0x482   : > { %v2880_v20 = vpop.f32.mrf.mxu0 }
 0x483   : > { %v2881_v4 = vadd.f32 %v2880_v20, %v2783_v55 }
 0x484   : > { %v4576_v27 = vpop.f32.mrf.mxu0 }
 0x485   : > { %v2896_v15 = vadd.f32 %v4576_v27, %v4554_v58 }
 0x486   : > { %v2890_v38 = vpop.f32.mrf.mxu0 }
 0x487   : > { %v2891_v31 = vadd.f32 %v2890_v38, %v2793_v6 }
 0x490   : > { %v4617_v36 = vpop.f32.mrf.mxu0 }
 0x492   : > { %v3134_v51 = vpop.f32.mrf.mxu0 }
 0x494   : > { %v4620_v0 = vpop.f32.mrf.mxu0 }
 0x496   : > { %v3144_v24 = vpop.f32.mrf.mxu0 }
 0x4d0   : > { %v3921_v9 = vpop.f32.mrf.mxu1 }
 0x4d2   : > { %v3922_v2 = vpop.f32.mrf.mxu1 }
 0x4d3   : > { %v3923_v18 = vadd.f32 %v3922_v2, %v3921_v9 }
 0x4d4   : > { %v3924_v25 = vpop.f32.mrf.mxu1 }
 0x4d5   : > { %v2634_v26 = vadd.f32 %v3923_v18, %v6057_v50 }
 0x4d6   : > { %v3925_v47 = vpop.f32.mrf.mxu1 }
 0x4d7   : > { %2653 = vst.msk [vmem:[%s6062_s24] sm:$0xff] %vm2652_vm4, %v2634_v26  ;;  %v3926_v42 = vadd.f32 %v3925_v47, %v3924_v25 }
 0x4d8   : > { %v3927_v53 = vpop.f32.mrf.mxu1 }
 0x4d9   : > { %v2639_v63 = vadd.f32 %v3926_v42, %v6057_v50 }
 0x4da   : > { %v3928_v59 = vpop.f32.mrf.mxu1 }
 0x4db   : > { %2654 = vst.msk [vmem:[%s6062_s24 + $0x8] sm:$0xff] %vm2652_vm4, %v2639_v63  ;;  %v3929_v46 = vadd.f32 %v3928_v59, %v3927_v53 }
 0x4dc   : > { %v3930_v37 = vpop.f32.mrf.mxu1 }
 0x4dd   : > { %v2644_v39 = vadd.f32 %v3929_v46, %v6057_v50 }
 0x4de   : > { %v3931_v41 = vpop.f32.mrf.mxu1 }
 0x4df   : > { %2655 = vst.msk [vmem:[%s6062_s24 + $0x10] sm:$0xff] %vm2652_vm4, %v2644_v39  ;;  %v3932_v44 = vadd.f32 %v3931_v41, %v3930_v37 }
 0x4e0   : > { %v4595_v40 = vpop.f32.mrf.mxu1 }
 0x4e1   : > { %v2649_v61 = vadd.f32 %v3932_v44, %v6057_v50  ;;  %v3025_v45 = vadd.f32 %v4595_v40, %v2886_v57 }
 0x4e2   : > { %v3005_v8 = vpop.f32.mrf.mxu1 }
 0x4e3   : > { %2656 = vst.msk [vmem:[%s6062_s24 + $0x18] sm:$0xff] %vm2652_vm4, %v2649_v61  ;;  %v3024_v49 = vadd.f32 %v3005_v8, %v2881_v4  ;;  %v3154_v19 = vadd.f32 %v4617_v36, %v3025_v45 }
 0x4e4   : > { %v4598_v52 = vpop.f32.mrf.mxu1 }
 0x4e5   : > { %v3153_v23 = vadd.f32 %v3134_v51, %v3024_v49  ;;  %v3182_v21 = vadd.f32 %v3169_v13, %v3154_v19  ;;  %v3027_v5 = vadd.f32 %v4598_v52, %v2896_v15 }
 0x4e6   : > { %v3015_v32 = vpop.f32.mrf.mxu1 }
 0x4e7   : > { %v3181_v12 = vadd.f32 %v3164_v43, %v3153_v23  ;;  %v3026_v56 = vadd.f32 %v3015_v32, %v2891_v31  ;;  %v3186_v11 = vmax.f32 %v3182_v21, 0.0  ;;  %v3156_v14 = vadd.f32 %v4620_v0, %v3027_v5 }
 0x4e9   : > { %v3185_v62 = vmax.f32 %v3181_v12, 0.0  ;;  %v3155_v10 = vadd.f32 %v3144_v24, %v3026_v56  ;;  %v3184_v3 = vadd.f32 %v3179_v7, %v3156_v14 }
 0x4eb   : > { %3617 = vmatmul.mubr.msk.f32.vlgmr.msra.gmra.mxu1 %vm2411_vm3, %v3185_v62  ;;  %v3183_v30 = vadd.f32 %v3174_v29, %v3155_v10  ;;  %v3188_v22 = vmax.f32 %v3184_v3, 0.0 }
 0x4ec   : > { %3305 = vmatprep.mubr.f32.mxu1 %v6183_v16 }
 0x4ed   : > { %v3187_v17 = vmax.f32 %v3183_v30, 0.0 }
 0x4ef   : > { %3618 = vmatmul.mubr.msk.f32.gmra.mxu1 %vm2411_vm3, %v3186_v11 }
 0x4f0   : > { %3311 = vmatprep.mubr.f32.mxu1 %v6183_v16 }
 0x4f3   : > { %3619 = vmatmul.mubr.msk.f32.gmra.mxu1 %vm2411_vm3, %v3187_v17 }
 0x4f4   : > { %3317 = vmatprep.mubr.f32.mxu1 %v6183_v16 }
 0x4f7   : > { %3620 = vmatmul.mubr.msk.f32.gmra.mxu1 %vm2411_vm3, %v3188_v22 }
 0x5ab   : > { %v3301_v54 = vpop.f32.mrf.mxu1 }
 0x5ac   : > { %v3302_v55 = vadd.f32 %v3301_v54, %v3210_v34 }
 0x5ad   : > { %v3303_v58 = vpop.f32.mrf.mxu1 }
 0x5ae   : > { %v3304_v6 = vadd.f32 %v3303_v58, %v3214_v35  ;;  %v3324_v16 = vmax.f32 %v3302_v55, 0.0 }
 0x5af   : > { %v3307_v60 = vpop.f32.mrf.mxu1 }
 0x5b0   : > { %v3325_v9 = vmax.f32 %v3304_v6, 0.0  ;;  %v3308_v2 = vadd.f32 %v3307_v60, %v3210_v34 }
 0x5b1   : > { %v3309_v18 = vpop.f32.mrf.mxu1 }
 0x5b2   : > { %v3310_v20 = vadd.f32 %v3309_v18, %v3214_v35  ;;  %3435 = vmatprep.mubr.f32.mxu0 %v3325_v9  ;;  %v3326_v27 = vmax.f32 %v3308_v2, 0.0 }
 0x5b3   : > { %v3313_v25 = vpop.f32.mrf.mxu1  ;;  %3436 = vmatmul.mubr.f32.vlgmr.msra.gmra.mxu0 %v3324_v16 }
 0x5b4   : > { %v3327_v26 = vmax.f32 %v3310_v20, 0.0  ;;  %v3314_v47 = vadd.f32 %v3313_v25, %v3210_v34 }
 0x5b5   : > { %v3315_v28 = vpop.f32.mrf.mxu1 }
 0x5b6   : > { %v3316_v42 = vadd.f32 %v3315_v28, %v3214_v35  ;;  %3440 = vmatprep.mubr.f32.mxu0 %v3327_v26  ;;  %v3328_v53 = vmax.f32 %v3314_v47, 0.0 }
 0x5b7   : > { %v3319_v1 = vpop.f32.mrf.mxu1  ;;  %3441 = vmatmul.mubr.f32.gmra.mxu0 %v3326_v27 }
 0x5b8   : > { %v3329_v48 = vmax.f32 %v3316_v42, 0.0  ;;  %v3320_v63 = vadd.f32 %v3319_v1, %v3210_v34 }
 0x5b9   : > { %v3321_v38 = vpop.f32.mrf.mxu1 }
 0x5ba   : > { %v3322_v59 = vadd.f32 %v3321_v38, %v3214_v35  ;;  %3445 = vmatprep.mubr.f32.mxu0 %v3329_v48  ;;  %v3330_v37 = vmax.f32 %v3320_v63, 0.0 }
 0x5bb   : > { %3446 = vmatmul.mubr.f32.gmra.mxu0 %v3328_v53 }
 0x5bc   : > { %v3331_v46 = vmax.f32 %v3322_v59, 0.0 }
 0x5be   : > { %3450 = vmatprep.mubr.f32.mxu0 %v3331_v46 }
 0x5bf   : > { %3451 = vmatmul.mubr.f32.gmra.mxu0 %v3330_v37 }
 0x673   : > { %v4013_v36 = vpop.f32.mrf.mxu0 }
 0x675   : > { %v4014_v39 = vpop.f32.mrf.mxu0 }
 0x676   : > { %v4015_v41 = vadd.f32 %v4014_v39, %v4013_v36 }
 0x677   : > { %v4016_v57 = vpop.f32.mrf.mxu0 }
 0x678   : > { %v3438_v44 = vadd.f32 %v4015_v41, %v6057_v50 }
 0x679   : > { %v4017_v40 = vpop.f32.mrf.mxu0 }
 0x67a   : > { %v4018_v51 = vadd.f32 %v4017_v40, %v4016_v57  ;;  %3460 = vrot.lane.b32.xlu1 %v3438_v44, %s4653_s26 }
 0x67b   : > { %v4019_v4 = vpop.f32.mrf.mxu0 }
 0x67c   : > { %v3443_v61 = vadd.f32 %v4018_v51, %v6057_v50 }
 0x67d   : > { %v4020_v45 = vpop.f32.mrf.mxu0 }
 0x67e   : > { %v4021_v8 = vadd.f32 %v4020_v45, %v4019_v4  ;;  %3462 = vrot.lane.b32.xlu0 %v3443_v61, %s4653_s26 }
 0x67f   : > { %v4022_v0 = vpop.f32.mrf.mxu0 }
 0x680   : > { %v3448_v49 = vadd.f32 %v4021_v8, %v6057_v50 }
 0x681   : > { %v4023_v52 = vpop.f32.mrf.mxu0 }
 0x682   : > { %v4024_v43 = vadd.f32 %v4023_v52, %v4022_v0  ;;  %3464 = vrot.lane.b32.xlu1 %v3448_v49, %s4653_s26 }
 0x684   : > { %v3453_v31 = vadd.f32 %v4024_v43, %v6057_v50 }
 0x686   : > { %3466 = vrot.lane.b32.xlu0 %v3453_v31, %s4653_s26 }
 0x6ec   : > { %v3461_v19 = vpop.permute.xlu1 %3460 }
 0x6ed   : > { %3473 = vst.msk [vmem:[%s6062_s24] sm:$0xff] %vm3472_vm5, %v3461_v19 }
 0x6f0   : > { %v3463_v23 = vpop.permute.xlu0 %3462 }
 0x6f1   : > { %3474 = vst.msk [vmem:[%s6062_s24 + $0x8] sm:$0xff] %vm3472_vm5, %v3463_v23 }
 0x6f4   : > { %v3465_v32 = vpop.permute.xlu1 %3464 }
 0x6f5   : > { %3475 = vst.msk [vmem:[%s6062_s24 + $0x10] sm:$0xff] %vm3472_vm5, %v3465_v32 }
 0x6f8   : > { %v3467_v24 = vpop.permute.xlu0 %3466 }
 0x6f9   : > { %3476 = vst.msk [vmem:[%s6062_s24 + $0x18] sm:$0xff] %vm3472_vm5, %v3467_v24 }
 0x6fa PF: > { %s19_s30 = sadd.s32 1, %s4646_s30  }
 0x6fb   : > { %p16_p4 = scmp.ge.s32.totalorder %s19_s30, 4  }
 0x6fd   :  { %18 = sbr.rel (!%p16_p4) target bundleno = 1 (0x1), region = 90 }

</bundles_post_ra>
